<compile_context>
chip_gen: v7x
topology: tpu7x:2x2x1
jax: 0.10.0
libtpu: 0.0.40
codegen_flags: <defaults>
</compile_context>

<pallas_src>
import functools
import math

import jax
import jax.numpy as jnp
from jax.experimental import pallas as pl
from jax.experimental.pallas import tpu as pltpu

NEG_SLOPE = 0.1


def _leaky_relu(h):
    return jnp.where(h > 0, h, NEG_SLOPE * h)


def _dense_vae_kernel(n_enc, n_dec, embedding_dim, x_ref, eps_ref, *refs):
    """refs = [W0, b0, W1, b1, ...] for encoder layers, fused mu|logvar head,
    decoder layers (in that order), followed by (y_ref, mulogvar_ref)."""
    param_refs = refs[:-2]
    y_ref, mulv_ref = refs[-2:]

    def linear(h, w_ref, b_ref):
        # bf16 operands into the MXU, f32 accumulation, f32 bias add.
        return (
            jnp.dot(
                h.astype(jnp.bfloat16),
                w_ref[...],
                preferred_element_type=jnp.float32,
            )
            + b_ref[...]
        )

    idx = 0
    h = x_ref[...]

    # ---- encoder: n_enc x (Linear + LeakyReLU) ----
    for _ in range(n_enc):
        h = _leaky_relu(linear(h, param_refs[idx], param_refs[idx + 1]))
        idx += 2

    # ---- fused mu | logvar head: one (B, 2E) matmul ----
    mulv = linear(h, param_refs[idx], param_refs[idx + 1])
    idx += 2
    mu = mulv[:, :embedding_dim]
    logvar = mulv[:, embedding_dim:]

    # ---- reparameterize (kept in-kernel: exp is EUP work, VPU has slack) ----
    z = eps_ref[...] * jnp.exp(0.5 * logvar) + mu

    # ---- decoder: (n_dec-1) x (Linear + LeakyReLU), final Linear ----
    h = z
    for _ in range(n_dec - 1):
        h = _leaky_relu(linear(h, param_refs[idx], param_refs[idx + 1]))
        idx += 2
    y = linear(h, param_refs[idx], param_refs[idx + 1])

    y_ref[...] = y.astype(y_ref.dtype)
    mulv_ref[...] = mulv.astype(mulv_ref.dtype)


def init_dense_vae_params(key, input_dim, embedding_dim, hidden_dims):
    """PyTorch nn.Linear-style uniform init.  Weights stored bf16, biases f32.
    The mu / logvar heads are fused along the output axis (fan_out = 2*E)."""

    def linear_params(k, fan_in, fan_out):
        k1, k2 = jax.random.split(k)
        bound = 1.0 / math.sqrt(fan_in)
        w = jax.random.uniform(k1, (fan_in, fan_out), jnp.float32, -bound, bound)
        b = jax.random.uniform(k2, (1, fan_out), jnp.float32, -bound, bound)
        return w, b

    layers = []
    d = input_dim
    # encoder
    for h_dim in hidden_dims:
        key, sub = jax.random.split(key)
        layers.append(linear_params(sub, d, h_dim))
        d = h_dim
    # fused mu | logvar head
    key, sub = jax.random.split(key)
    w_mu, b_mu = linear_params(sub, hidden_dims[-1], embedding_dim)
    key, sub = jax.random.split(key)
    w_lv, b_lv = linear_params(sub, hidden_dims[-1], embedding_dim)
    layers.append(
        (jnp.concatenate([w_mu, w_lv], axis=1), jnp.concatenate([b_mu, b_lv], axis=1))
    )
    # decoder (reversed hidden dims + final projection back to input_dim)
    d = embedding_dim
    for h_dim in reversed(hidden_dims):
        key, sub = jax.random.split(key)
        layers.append(linear_params(sub, d, h_dim))
        d = h_dim
    key, sub = jax.random.split(key)
    layers.append(linear_params(sub, d, input_dim))

    params = []
    for w, b in layers:
        params.append(w.astype(jnp.bfloat16))  # bf16 weights for the MXU
        params.append(b)                       # f32 biases
    return params


def dense_vae_forward(
    x, eps, params, input_dim, embedding_dim, hidden_dims, tile_b=128
):
    """Returns (y, x, mu, logvar) — same tuple as the PyTorch forward."""
    batch = x.shape[0]
    n_enc = len(hidden_dims)
    n_dec = len(hidden_dims) + 1

    # Pad the batch to a multiple of the tile size so the grid tiles evenly.
    padded = ((batch + tile_b - 1) // tile_b) * tile_b
    if padded != batch:
        x_p = jnp.zeros((padded, input_dim), x.dtype).at[:batch].set(x)
        eps_p = jnp.zeros((padded, embedding_dim), eps.dtype).at[:batch].set(eps)
    else:
        x_p, eps_p = x, eps

    grid = (padded // tile_b,)
    kernel = functools.partial(_dense_vae_kernel, n_enc, n_dec, embedding_dim)

    # Activation tiles stream over the batch grid; weights/biases stay resident.
    x_spec = pl.BlockSpec((tile_b, input_dim), lambda b: (b, 0))
    eps_spec = pl.BlockSpec((tile_b, embedding_dim), lambda b: (b, 0))
    param_specs = [pl.BlockSpec(p.shape, lambda b: (0, 0)) for p in params]
    y_spec = pl.BlockSpec((tile_b, input_dim), lambda b: (b, 0))
    mulv_spec = pl.BlockSpec((tile_b, 2 * embedding_dim), lambda b: (b, 0))

    out_shapes = (
        jax.ShapeDtypeStruct((padded, input_dim), jnp.float32),          # y
        jax.ShapeDtypeStruct((padded, 2 * embedding_dim), jnp.float32),  # mu|logvar
    )

    # --- VMEM budget (re-derived for v7x's 64 MiB physical VMEM) ---
    param_bytes = sum(int(p.size) * p.dtype.itemsize for p in params)
    io_bytes = 2 * tile_b * (2 * input_dim + 3 * embedding_dim) * 4  # dbl-buffered
    inter_bytes = (
        4 * tile_b * max([input_dim, 2 * embedding_dim] + list(hidden_dims)) * 4
    )
    vmem_limit = min(
        max(int(1.5 * (param_bytes + io_bytes + inter_bytes)) + (8 << 20), 32 << 20),
        64 << 20,
    )

    # --- advisory cost estimate for the XLA scheduler ---
    layer_pairs = []
    d = input_dim
    for h in hidden_dims:
        layer_pairs.append((d, h))
        d = h
    layer_pairs.append((d, 2 * embedding_dim))
    d = embedding_dim
    for h in reversed(hidden_dims):
        layer_pairs.append((d, h))
        d = h
    layer_pairs.append((d, input_dim))
    flops = 2 * padded * sum(a * b for a, b in layer_pairs)
    bytes_accessed = param_bytes + padded * (2 * input_dim + 3 * embedding_dim) * 4
    cost = pl.CostEstimate(
        flops=flops,
        transcendentals=padded * embedding_dim,
        bytes_accessed=bytes_accessed,
    )

    # TODO(synk): skinny lane dims (32/64 < 128) could be zero-padded to 128 in
    # the stored weights for fully lane-dense vregs; skipped to keep the
    # parameter layout identical to the PyTorch checkpoint.
    y_p, mulv_p = pl.pallas_call(
        kernel,
        out_shape=out_shapes,
        grid=grid,
        in_specs=[x_spec, eps_spec] + param_specs,
        out_specs=(y_spec, mulv_spec),
        compiler_params=pltpu.CompilerParams(
            dimension_semantics=("parallel",),  # megacore sharding on v7x
            vmem_limit_bytes=vmem_limit,
        ),
        cost_estimate=cost,
    )(x_p, eps_p, *params)

    y = y_p[:batch]
    mu = mulv_p[:batch, :embedding_dim]
    logvar = mulv_p[:batch, embedding_dim:]
    return y, x, mu, logvar


def _reference_forward(x, eps, params, embedding_dim, hidden_dims):
    """Pure-JAX reference with identical numerics (bf16 matmul, f32 accum)."""
    idx = 0

    def lin(h):
        nonlocal idx
        w, b = params[idx], params[idx + 1]
        idx += 2
        return (
            jnp.dot(h.astype(jnp.bfloat16), w, preferred_element_type=jnp.float32)
            + b
        )

    h = x
    for _ in hidden_dims:
        h = lin(h)
        h = jnp.where(h > 0, h, NEG_SLOPE * h)
    mulv = lin(h)
    mu = mulv[:, :embedding_dim]
    logvar = mulv[:, embedding_dim:]
    z = eps * jnp.exp(0.5 * logvar) + mu
    h = z
    for _ in hidden_dims:
        h = lin(h)
        h = jnp.where(h > 0, h, NEG_SLOPE * h)
    y = lin(h)
    return y, mu, logvar


if __name__ == "__main__":
    # Small, module-consistent shapes (original: 1024 / 64 / [512, 256, 128]).
    INPUT_DIM = 256
    EMBEDDING_DIM = 32
    HIDDEN_DIMS = [128, 64, 32]
    BATCH = 256          # 2 grid steps at TILE_B=128 -> exercises the pipeline
    TILE_B = 128

    key = jax.random.PRNGKey(0)
    k_x, k_eps, k_params = jax.random.split(key, 3)

    x = jax.random.normal(k_x, (BATCH, INPUT_DIM), jnp.float32)
    # eps for the reparameterization trick is drawn outside the kernel so the
    # forward is deterministic and reproducible.
    eps = jax.random.normal(k_eps, (BATCH, EMBEDDING_DIM), jnp.float32)

    params = init_dense_vae_params(k_params, INPUT_DIM, EMBEDDING_DIM, HIDDEN_DIMS)

    y, x_out, mu, logvar = dense_vae_forward(
        x, eps, params, INPUT_DIM, EMBEDDING_DIM, HIDDEN_DIMS, tile_b=TILE_B
    )
    jax.block_until_ready((y, x_out, mu, logvar))

    # Validate against a pure-JAX reference with the same bf16/f32 numerics.
    y_ref, mu_ref, lv_ref = _reference_forward(x, eps, params, EMBEDDING_DIM, HIDDEN_DIMS)
    assert jnp.allclose(y, y_ref, atol=2e-2, rtol=2e-2), "y mismatch"
    assert jnp.allclose(mu, mu_ref, atol=2e-2, rtol=2e-2), "mu mismatch"
    assert jnp.allclose(logvar, lv_ref, atol=2e-2, rtol=2e-2), "logvar mismatch"
    assert jnp.allclose(x_out, x), "x passthrough mismatch"

    print("KERNEL_OK")
</pallas_src>

<mosaic_0001>
module attributes {stable_mosaic.version = 11 : i64} {
  func.func @_dense_vae_kernel(%arg0: i32, %arg1: memref<128x256xf32, #tpu.memory_space<vmem>>, %arg2: memref<128x32xf32, #tpu.memory_space<vmem>>, %arg3: memref<256x128xbf16, #tpu.memory_space<vmem>>, %arg4: memref<1x128xf32, #tpu.memory_space<vmem>>, %arg5: memref<128x64xbf16, #tpu.memory_space<vmem>>, %arg6: memref<1x64xf32, #tpu.memory_space<vmem>>, %arg7: memref<64x32xbf16, #tpu.memory_space<vmem>>, %arg8: memref<1x32xf32, #tpu.memory_space<vmem>>, %arg9: memref<32x64xbf16, #tpu.memory_space<vmem>>, %arg10: memref<1x64xf32, #tpu.memory_space<vmem>>, %arg11: memref<32x32xbf16, #tpu.memory_space<vmem>>, %arg12: memref<1x32xf32, #tpu.memory_space<vmem>>, %arg13: memref<32x64xbf16, #tpu.memory_space<vmem>>, %arg14: memref<1x64xf32, #tpu.memory_space<vmem>>, %arg15: memref<64x128xbf16, #tpu.memory_space<vmem>>, %arg16: memref<1x128xf32, #tpu.memory_space<vmem>>, %arg17: memref<128x256xbf16, #tpu.memory_space<vmem>>, %arg18: memref<1x256xf32, #tpu.memory_space<vmem>>, %arg19: memref<128x256xf32, #tpu.memory_space<vmem>>, %arg20: memref<128x64xf32, #tpu.memory_space<vmem>>) attributes {dimension_semantics = [#tpu.dimension_semantics<parallel>], iteration_bounds = array<i64: 2>, scalar_prefetch = 0 : i64, scratch_operands = 0 : i64, tpu.core_type = #tpu.core_type<tc>, window_params = [{transform_indices = @transform_0, window_bounds = array<i64: 128, 256>}, {transform_indices = @transform_1, window_bounds = array<i64: 128, 32>}, {pipeline_mode = #tpu.pipeline_mode<synchronous>, transform_indices = @transform_2, window_bounds = array<i64: 256, 128>}, {pipeline_mode = #tpu.pipeline_mode<synchronous>, transform_indices = @transform_3, window_bounds = array<i64: 1, 128>}, {pipeline_mode = #tpu.pipeline_mode<synchronous>, transform_indices = @transform_4, window_bounds = array<i64: 128, 64>}, {pipeline_mode = #tpu.pipeline_mode<synchronous>, transform_indices = @transform_5, window_bounds = array<i64: 1, 64>}, {pipeline_mode = #tpu.pipeline_mode<synchronous>, transform_indices = @transform_6, window_bounds = array<i64: 64, 32>}, {pipeline_mode = #tpu.pipeline_mode<synchronous>, transform_indices = @transform_7, window_bounds = array<i64: 1, 32>}, {pipeline_mode = #tpu.pipeline_mode<synchronous>, transform_indices = @transform_8, window_bounds = array<i64: 32, 64>}, {pipeline_mode = #tpu.pipeline_mode<synchronous>, transform_indices = @transform_9, window_bounds = array<i64: 1, 64>}, {pipeline_mode = #tpu.pipeline_mode<synchronous>, transform_indices = @transform_10, window_bounds = array<i64: 32, 32>}, {pipeline_mode = #tpu.pipeline_mode<synchronous>, transform_indices = @transform_11, window_bounds = array<i64: 1, 32>}, {pipeline_mode = #tpu.pipeline_mode<synchronous>, transform_indices = @transform_12, window_bounds = array<i64: 32, 64>}, {pipeline_mode = #tpu.pipeline_mode<synchronous>, transform_indices = @transform_13, window_bounds = array<i64: 1, 64>}, {pipeline_mode = #tpu.pipeline_mode<synchronous>, transform_indices = @transform_14, window_bounds = array<i64: 64, 128>}, {pipeline_mode = #tpu.pipeline_mode<synchronous>, transform_indices = @transform_15, window_bounds = array<i64: 1, 128>}, {pipeline_mode = #tpu.pipeline_mode<synchronous>, transform_indices = @transform_16, window_bounds = array<i64: 128, 256>}, {pipeline_mode = #tpu.pipeline_mode<synchronous>, transform_indices = @transform_17, window_bounds = array<i64: 1, 256>}, {transform_indices = @transform_18, window_bounds = array<i64: 128, 256>}, {transform_indices = @transform_19, window_bounds = array<i64: 128, 64>}]} {
    %c0 = arith.constant 0 : index
    %c0_0 = arith.constant 0 : index
    %0 = vector.load %arg1[%c0, %c0_0] : memref<128x256xf32, #tpu.memory_space<vmem>>, vector<128x256xf32>
    %1 = arith.truncf %0 : vector<128x256xf32> to vector<128x256xbf16>
    %c0_1 = arith.constant 0 : index
    %c0_2 = arith.constant 0 : index
    %2 = vector.load %arg3[%c0_1, %c0_2] : memref<256x128xbf16, #tpu.memory_space<vmem>>, vector<256x128xbf16>
    %cst = arith.constant dense<0.000000e+00> : vector<128x128xf32>
    %3 = tpu.matmul %1, %2, %cst {dimension_numbers = #tpu.dot_dimension_numbers<[1], [0], [0], [1], [0, 0, 1, 1], [], []>} : vector<128x256xbf16>, vector<256x128xbf16>, vector<128x128xf32> -> vector<128x128xf32>
    %c0_3 = arith.constant 0 : index
    %c0_4 = arith.constant 0 : index
    %4 = vector.load %arg4[%c0_3, %c0_4] : memref<1x128xf32, #tpu.memory_space<vmem>>, vector<1x128xf32>
    %5 = vector.broadcast %4 : vector<1x128xf32> to vector<128x128xf32>
    %6 = arith.addf %3, %5 : vector<128x128xf32>
    %cst_5 = arith.constant 0.000000e+00 : f32
    %7 = vector.broadcast %cst_5 : f32 to vector<128x128xf32>
    %8 = arith.cmpf ogt, %6, %7 : vector<128x128xf32>
    %cst_6 = arith.constant 1.000000e-01 : f32
    %9 = vector.broadcast %cst_6 : f32 to vector<128x128xf32>
    %10 = arith.mulf %9, %6 : vector<128x128xf32>
    %11 = arith.select %8, %6, %10 : vector<128x128xi1>, vector<128x128xf32>
    %12 = arith.truncf %11 : vector<128x128xf32> to vector<128x128xbf16>
    %c0_7 = arith.constant 0 : index
    %c0_8 = arith.constant 0 : index
    %13 = vector.load %arg5[%c0_7, %c0_8] : memref<128x64xbf16, #tpu.memory_space<vmem>>, vector<128x64xbf16>
    %cst_9 = arith.constant dense<0.000000e+00> : vector<128x64xf32>
    %14 = tpu.matmul %12, %13, %cst_9 {dimension_numbers = #tpu.dot_dimension_numbers<[1], [0], [0], [1], [0, 0, 1, 1], [], []>} : vector<128x128xbf16>, vector<128x64xbf16>, vector<128x64xf32> -> vector<128x64xf32>
    %c0_10 = arith.constant 0 : index
    %c0_11 = arith.constant 0 : index
    %15 = vector.load %arg6[%c0_10, %c0_11] : memref<1x64xf32, #tpu.memory_space<vmem>>, vector<1x64xf32>
    %16 = vector.broadcast %15 : vector<1x64xf32> to vector<128x64xf32>
    %17 = arith.addf %14, %16 : vector<128x64xf32>
    %cst_12 = arith.constant 0.000000e+00 : f32
    %18 = vector.broadcast %cst_12 : f32 to vector<128x64xf32>
    %19 = arith.cmpf ogt, %17, %18 : vector<128x64xf32>
    %cst_13 = arith.constant 1.000000e-01 : f32
    %20 = vector.broadcast %cst_13 : f32 to vector<128x64xf32>
    %21 = arith.mulf %20, %17 : vector<128x64xf32>
    %22 = arith.select %19, %17, %21 : vector<128x64xi1>, vector<128x64xf32>
    %23 = arith.truncf %22 : vector<128x64xf32> to vector<128x64xbf16>
    %c0_14 = arith.constant 0 : index
    %c0_15 = arith.constant 0 : index
    %24 = vector.load %arg7[%c0_14, %c0_15] : memref<64x32xbf16, #tpu.memory_space<vmem>>, vector<64x32xbf16>
    %cst_16 = arith.constant dense<0.000000e+00> : vector<128x32xf32>
    %25 = tpu.matmul %23, %24, %cst_16 {dimension_numbers = #tpu.dot_dimension_numbers<[1], [0], [0], [1], [0, 0, 1, 1], [], []>} : vector<128x64xbf16>, vector<64x32xbf16>, vector<128x32xf32> -> vector<128x32xf32>
    %c0_17 = arith.constant 0 : index
    %c0_18 = arith.constant 0 : index
    %26 = vector.load %arg8[%c0_17, %c0_18] : memref<1x32xf32, #tpu.memory_space<vmem>>, vector<1x32xf32>
    %27 = vector.broadcast %26 : vector<1x32xf32> to vector<128x32xf32>
    %28 = arith.addf %25, %27 : vector<128x32xf32>
    %cst_19 = arith.constant 0.000000e+00 : f32
    %29 = vector.broadcast %cst_19 : f32 to vector<128x32xf32>
    %30 = arith.cmpf ogt, %28, %29 : vector<128x32xf32>
    %cst_20 = arith.constant 1.000000e-01 : f32
    %31 = vector.broadcast %cst_20 : f32 to vector<128x32xf32>
    %32 = arith.mulf %31, %28 : vector<128x32xf32>
    %33 = arith.select %30, %28, %32 : vector<128x32xi1>, vector<128x32xf32>
    %34 = arith.truncf %33 : vector<128x32xf32> to vector<128x32xbf16>
    %c0_21 = arith.constant 0 : index
    %c0_22 = arith.constant 0 : index
    %35 = vector.load %arg9[%c0_21, %c0_22] : memref<32x64xbf16, #tpu.memory_space<vmem>>, vector<32x64xbf16>
    %cst_23 = arith.constant dense<0.000000e+00> : vector<128x64xf32>
    %36 = tpu.matmul %34, %35, %cst_23 {dimension_numbers = #tpu.dot_dimension_numbers<[1], [0], [0], [1], [0, 0, 1, 1], [], []>} : vector<128x32xbf16>, vector<32x64xbf16>, vector<128x64xf32> -> vector<128x64xf32>
    %c0_24 = arith.constant 0 : index
    %c0_25 = arith.constant 0 : index
    %37 = vector.load %arg10[%c0_24, %c0_25] : memref<1x64xf32, #tpu.memory_space<vmem>>, vector<1x64xf32>
    %38 = vector.broadcast %37 : vector<1x64xf32> to vector<128x64xf32>
    %39 = arith.addf %36, %38 : vector<128x64xf32>
    %40 = vector.extract_strided_slice %39 {offsets = [0, 0], sizes = [128, 32], strides = [1, 1]} : vector<128x64xf32> to vector<128x32xf32>
    %41 = vector.extract_strided_slice %39 {offsets = [0, 32], sizes = [128, 32], strides = [1, 1]} : vector<128x64xf32> to vector<128x32xf32>
    %c0_26 = arith.constant 0 : index
    %c0_27 = arith.constant 0 : index
    %42 = vector.load %arg2[%c0_26, %c0_27] : memref<128x32xf32, #tpu.memory_space<vmem>>, vector<128x32xf32>
    %cst_28 = arith.constant 5.000000e-01 : f32
    %43 = vector.broadcast %cst_28 : f32 to vector<128x32xf32>
    %44 = arith.mulf %43, %41 : vector<128x32xf32>
    %45 = math.exp %44 : vector<128x32xf32>
    %46 = arith.mulf %42, %45 : vector<128x32xf32>
    %47 = arith.addf %46, %40 : vector<128x32xf32>
    %48 = arith.truncf %47 : vector<128x32xf32> to vector<128x32xbf16>
    %c0_29 = arith.constant 0 : index
    %c0_30 = arith.constant 0 : index
    %49 = vector.load %arg11[%c0_29, %c0_30] : memref<32x32xbf16, #tpu.memory_space<vmem>>, vector<32x32xbf16>
    %cst_31 = arith.constant dense<0.000000e+00> : vector<128x32xf32>
    %50 = tpu.matmul %48, %49, %cst_31 {dimension_numbers = #tpu.dot_dimension_numbers<[1], [0], [0], [1], [0, 0, 1, 1], [], []>} : vector<128x32xbf16>, vector<32x32xbf16>, vector<128x32xf32> -> vector<128x32xf32>
    %c0_32 = arith.constant 0 : index
    %c0_33 = arith.constant 0 : index
    %51 = vector.load %arg12[%c0_32, %c0_33] : memref<1x32xf32, #tpu.memory_space<vmem>>, vector<1x32xf32>
    %52 = vector.broadcast %51 : vector<1x32xf32> to vector<128x32xf32>
    %53 = arith.addf %50, %52 : vector<128x32xf32>
    %cst_34 = arith.constant 0.000000e+00 : f32
    %54 = vector.broadcast %cst_34 : f32 to vector<128x32xf32>
    %55 = arith.cmpf ogt, %53, %54 : vector<128x32xf32>
    %cst_35 = arith.constant 1.000000e-01 : f32
    %56 = vector.broadcast %cst_35 : f32 to vector<128x32xf32>
    %57 = arith.mulf %56, %53 : vector<128x32xf32>
    %58 = arith.select %55, %53, %57 : vector<128x32xi1>, vector<128x32xf32>
    %59 = arith.truncf %58 : vector<128x32xf32> to vector<128x32xbf16>
    %c0_36 = arith.constant 0 : index
    %c0_37 = arith.constant 0 : index
    %60 = vector.load %arg13[%c0_36, %c0_37] : memref<32x64xbf16, #tpu.memory_space<vmem>>, vector<32x64xbf16>
    %cst_38 = arith.constant dense<0.000000e+00> : vector<128x64xf32>
    %61 = tpu.matmul %59, %60, %cst_38 {dimension_numbers = #tpu.dot_dimension_numbers<[1], [0], [0], [1], [0, 0, 1, 1], [], []>} : vector<128x32xbf16>, vector<32x64xbf16>, vector<128x64xf32> -> vector<128x64xf32>
    %c0_39 = arith.constant 0 : index
    %c0_40 = arith.constant 0 : index
    %62 = vector.load %arg14[%c0_39, %c0_40] : memref<1x64xf32, #tpu.memory_space<vmem>>, vector<1x64xf32>
    %63 = vector.broadcast %62 : vector<1x64xf32> to vector<128x64xf32>
    %64 = arith.addf %61, %63 : vector<128x64xf32>
    %cst_41 = arith.constant 0.000000e+00 : f32
    %65 = vector.broadcast %cst_41 : f32 to vector<128x64xf32>
    %66 = arith.cmpf ogt, %64, %65 : vector<128x64xf32>
    %cst_42 = arith.constant 1.000000e-01 : f32
    %67 = vector.broadcast %cst_42 : f32 to vector<128x64xf32>
    %68 = arith.mulf %67, %64 : vector<128x64xf32>
    %69 = arith.select %66, %64, %68 : vector<128x64xi1>, vector<128x64xf32>
    %70 = arith.truncf %69 : vector<128x64xf32> to vector<128x64xbf16>
    %c0_43 = arith.constant 0 : index
    %c0_44 = arith.constant 0 : index
    %71 = vector.load %arg15[%c0_43, %c0_44] : memref<64x128xbf16, #tpu.memory_space<vmem>>, vector<64x128xbf16>
    %cst_45 = arith.constant dense<0.000000e+00> : vector<128x128xf32>
    %72 = tpu.matmul %70, %71, %cst_45 {dimension_numbers = #tpu.dot_dimension_numbers<[1], [0], [0], [1], [0, 0, 1, 1], [], []>} : vector<128x64xbf16>, vector<64x128xbf16>, vector<128x128xf32> -> vector<128x128xf32>
    %c0_46 = arith.constant 0 : index
    %c0_47 = arith.constant 0 : index
    %73 = vector.load %arg16[%c0_46, %c0_47] : memref<1x128xf32, #tpu.memory_space<vmem>>, vector<1x128xf32>
    %74 = vector.broadcast %73 : vector<1x128xf32> to vector<128x128xf32>
    %75 = arith.addf %72, %74 : vector<128x128xf32>
    %cst_48 = arith.constant 0.000000e+00 : f32
    %76 = vector.broadcast %cst_48 : f32 to vector<128x128xf32>
    %77 = arith.cmpf ogt, %75, %76 : vector<128x128xf32>
    %cst_49 = arith.constant 1.000000e-01 : f32
    %78 = vector.broadcast %cst_49 : f32 to vector<128x128xf32>
    %79 = arith.mulf %78, %75 : vector<128x128xf32>
    %80 = arith.select %77, %75, %79 : vector<128x128xi1>, vector<128x128xf32>
    %81 = arith.truncf %80 : vector<128x128xf32> to vector<128x128xbf16>
    %c0_50 = arith.constant 0 : index
    %c0_51 = arith.constant 0 : index
    %82 = vector.load %arg17[%c0_50, %c0_51] : memref<128x256xbf16, #tpu.memory_space<vmem>>, vector<128x256xbf16>
    %cst_52 = arith.constant dense<0.000000e+00> : vector<128x256xf32>
    %83 = tpu.matmul %81, %82, %cst_52 {dimension_numbers = #tpu.dot_dimension_numbers<[1], [0], [0], [1], [0, 0, 1, 1], [], []>} : vector<128x128xbf16>, vector<128x256xbf16>, vector<128x256xf32> -> vector<128x256xf32>
    %c0_53 = arith.constant 0 : index
    %c0_54 = arith.constant 0 : index
    %84 = vector.load %arg18[%c0_53, %c0_54] : memref<1x256xf32, #tpu.memory_space<vmem>>, vector<1x256xf32>
    %85 = vector.broadcast %84 : vector<1x256xf32> to vector<128x256xf32>
    %86 = arith.addf %83, %85 : vector<128x256xf32>
    %c0_55 = arith.constant 0 : index
    %c0_56 = arith.constant 0 : index
    %87 = vector.load %arg19[%c0_55, %c0_56] : memref<128x256xf32, #tpu.memory_space<vmem>>, vector<128x256xf32>
    tpu.vector_store %arg19[%c0_55, %c0_56], %86 {strides = array<i32>} : memref<128x256xf32, #tpu.memory_space<vmem>>, vector<128x256xf32>,
    %c0_57 = arith.constant 0 : index
    %c0_58 = arith.constant 0 : index
    %88 = vector.load %arg20[%c0_57, %c0_58] : memref<128x64xf32, #tpu.memory_space<vmem>>, vector<128x64xf32>
    tpu.vector_store %arg20[%c0_57, %c0_58], %39 {strides = array<i32>} : memref<128x64xf32, #tpu.memory_space<vmem>>, vector<128x64xf32>,
    return
  }
  func.func @transform_0(%arg0: i32) -> (i32, i32) {
    %c0_i32 = arith.constant 0 : i32
    %c0_i32_0 = arith.constant 0 : i32
    return %arg0, %c0_i32 : i32, i32
  }
  func.func @transform_1(%arg0: i32) -> (i32, i32) {
    %c0_i32 = arith.constant 0 : i32
    %c0_i32_0 = arith.constant 0 : i32
    return %arg0, %c0_i32 : i32, i32
  }
  func.func @transform_2(%arg0: i32) -> (i32, i32) {
    %c0_i32 = arith.constant 0 : i32
    %c0_i32_0 = arith.constant 0 : i32
    %c0_i32_1 = arith.constant 0 : i32
    return %c0_i32, %c0_i32_0 : i32, i32
  }
  func.func @transform_3(%arg0: i32) -> (i32, i32) {
    %c0_i32 = arith.constant 0 : i32
    %c0_i32_0 = arith.constant 0 : i32
    %c0_i32_1 = arith.constant 0 : i32
    return %c0_i32, %c0_i32_0 : i32, i32
  }
  func.func @transform_4(%arg0: i32) -> (i32, i32) {
    %c0_i32 = arith.constant 0 : i32
    %c0_i32_0 = arith.constant 0 : i32
    %c0_i32_1 = arith.constant 0 : i32
    return %c0_i32, %c0_i32_0 : i32, i32
  }
  func.func @transform_5(%arg0: i32) -> (i32, i32) {
    %c0_i32 = arith.constant 0 : i32
    %c0_i32_0 = arith.constant 0 : i32
    %c0_i32_1 = arith.constant 0 : i32
    return %c0_i32, %c0_i32_0 : i32, i32
  }
  func.func @transform_6(%arg0: i32) -> (i32, i32) {
    %c0_i32 = arith.constant 0 : i32
    %c0_i32_0 = arith.constant 0 : i32
    %c0_i32_1 = arith.constant 0 : i32
    return %c0_i32, %c0_i32_0 : i32, i32
  }
  func.func @transform_7(%arg0: i32) -> (i32, i32) {
    %c0_i32 = arith.constant 0 : i32
    %c0_i32_0 = arith.constant 0 : i32
    %c0_i32_1 = arith.constant 0 : i32
    return %c0_i32, %c0_i32_0 : i32, i32
  }
  func.func @transform_8(%arg0: i32) -> (i32, i32) {
    %c0_i32 = arith.constant 0 : i32
    %c0_i32_0 = arith.constant 0 : i32
    %c0_i32_1 = arith.constant 0 : i32
    return %c0_i32, %c0_i32_0 : i32, i32
  }
  func.func @transform_9(%arg0: i32) -> (i32, i32) {
    %c0_i32 = arith.constant 0 : i32
    %c0_i32_0 = arith.constant 0 : i32
    %c0_i32_1 = arith.constant 0 : i32
    return %c0_i32, %c0_i32_0 : i32, i32
  }
  func.func @transform_10(%arg0: i32) -> (i32, i32) {
    %c0_i32 = arith.constant 0 : i32
    %c0_i32_0 = arith.constant 0 : i32
    %c0_i32_1 = arith.constant 0 : i32
    return %c0_i32, %c0_i32_0 : i32, i32
  }
  func.func @transform_11(%arg0: i32) -> (i32, i32) {
    %c0_i32 = arith.constant 0 : i32
    %c0_i32_0 = arith.constant 0 : i32
    %c0_i32_1 = arith.constant 0 : i32
    return %c0_i32, %c0_i32_0 : i32, i32
  }
  func.func @transform_12(%arg0: i32) -> (i32, i32) {
    %c0_i32 = arith.constant 0 : i32
    %c0_i32_0 = arith.constant 0 : i32
    %c0_i32_1 = arith.constant 0 : i32
    return %c0_i32, %c0_i32_0 : i32, i32
  }
  func.func @transform_13(%arg0: i32) -> (i32, i32) {
    %c0_i32 = arith.constant 0 : i32
    %c0_i32_0 = arith.constant 0 : i32
    %c0_i32_1 = arith.constant 0 : i32
    return %c0_i32, %c0_i32_0 : i32, i32
  }
  func.func @transform_14(%arg0: i32) -> (i32, i32) {
    %c0_i32 = arith.constant 0 : i32
    %c0_i32_0 = arith.constant 0 : i32
    %c0_i32_1 = arith.constant 0 : i32
    return %c0_i32, %c0_i32_0 : i32, i32
  }
  func.func @transform_15(%arg0: i32) -> (i32, i32) {
    %c0_i32 = arith.constant 0 : i32
    %c0_i32_0 = arith.constant 0 : i32
    %c0_i32_1 = arith.constant 0 : i32
    return %c0_i32, %c0_i32_0 : i32, i32
  }
  func.func @transform_16(%arg0: i32) -> (i32, i32) {
    %c0_i32 = arith.constant 0 : i32
    %c0_i32_0 = arith.constant 0 : i32
    %c0_i32_1 = arith.constant 0 : i32
    return %c0_i32, %c0_i32_0 : i32, i32
  }
  func.func @transform_17(%arg0: i32) -> (i32, i32) {
    %c0_i32 = arith.constant 0 : i32
    %c0_i32_0 = arith.constant 0 : i32
    %c0_i32_1 = arith.constant 0 : i32
    return %c0_i32, %c0_i32_0 : i32, i32
  }
  func.func @transform_18(%arg0: i32) -> (i32, i32) {
    %c0_i32 = arith.constant 0 : i32
    %c0_i32_0 = arith.constant 0 : i32
    return %arg0, %c0_i32 : i32, i32
  }
  func.func @transform_19(%arg0: i32) -> (i32, i32) {
    %c0_i32 = arith.constant 0 : i32
    %c0_i32_0 = arith.constant 0 : i32
    return %arg0, %c0_i32 : i32, i32
  }
}

</mosaic_0001>

<bundles_post_ra>
// kernel: tpu_custom_call.1
= control target key start
LH: loop header
LB: loop body
LE: loop exit
PB: predicated region body
PF: predicated region fallthrough
CT: control target
= control target key end

     0   :  { %s4350_s0 = inlined_call_operand.hbm [shape: f32[256,256], index: 0, kind: input, shape index: {}]   ;;  %s4351_s1 = inlined_call_operand.vmem [shape: f32[256,32], index: 1, kind: input, shape index: {}]   ;;  %s4352_s2 = inlined_call_operand.vmem [shape: bf16[256,128], index: 2, kind: input, shape index: {}]   ;;  %s4353_s3 = inlined_call_operand.vmem [shape: f32[1,128], index: 3, kind: input, shape index: {}]   ;;  %s4354_s4 = inlined_call_operand.vmem [shape: bf16[128,64], index: 4, kind: input, shape index: {}]   ;;  %s4355_s5 = inlined_call_operand.vmem [shape: f32[1,64], index: 5, kind: input, shape index: {}]   ;;  %s4356_s6 = inlined_call_operand.vmem [shape: bf16[64,32], index: 6, kind: input, shape index: {}]   ;;  %s4357_s7 = inlined_call_operand.vmem [shape: f32[1,32], index: 7, kind: input, shape index: {}]   ;;  %s4358_s8 = inlined_call_operand.vmem [shape: bf16[32,64], index: 8, kind: input, shape index: {}]   ;;  %s4359_s9 = inlined_call_operand.vmem [shape: f32[1,64], index: 9, kind: input, shape index: {}]   ;;  %s4360_s10 = inlined_call_operand.vmem [shape: bf16[32,32], index: 10, kind: input, shape index: {}]   ;;  %s4361_s11 = inlined_call_operand.vmem [shape: f32[1,32], index: 11, kind: input, shape index: {}]   ;;  %s4362_s12 = inlined_call_operand.vmem [shape: bf16[32,64], index: 12, kind: input, shape index: {}]   ;;  %s4363_s13 = inlined_call_operand.vmem [shape: f32[1,64], index: 13, kind: input, shape index: {}]   ;;  %s4364_s14 = inlined_call_operand.vmem [shape: bf16[64,128], index: 14, kind: input, shape index: {}]   ;;  %s4365_s15 = inlined_call_operand.vmem [shape: f32[1,128], index: 15, kind: input, shape index: {}]   ;;  %s4366_s16 = inlined_call_operand.vmem [shape: bf16[128,256], index: 16, kind: input, shape index: {}]   ;;  %s4367_s17 = inlined_call_operand.vmem [shape: f32[1,256], index: 17, kind: input, shape index: {}]   ;;  %s4368_s18 = inlined_call_operand.hbm [shape: f32[256,256], index: 18, kind: output, shape index: {0}]   ;;  %s4369_s19 = inlined_call_operand.vmem [shape: f32[256,64], index: 19, kind: output, shape index: {1}]  }
   0x1   :  { %4382 = sst [smem:[#allocation13_spill]] %s4350_s0 }
   0x2   :  { %4383 = sst [smem:[#allocation14_spill]] %s4351_s1 }
   0x3   :  { %4384 = sst [smem:[#allocation15_spill]] %s4352_s2 }
   0x4   :  { %4385 = sst [smem:[#allocation16_spill]] %s4353_s3 }
   0x5   :  { %4386 = sst [smem:[#allocation17_spill]] %s4365_s15 }
   0x6   :  { %4387 = sst [smem:[#allocation18_spill]] %s4367_s17 }
   0x7   :  { %4388 = sst [smem:[#allocation19_spill]] %s4368_s18 }
   0x8   :  { %25 = vsyncpa [#allocation3], 0 }
   0x9   :  { %27 = vsyncpa [#allocation3 + $0x1], 0 }
   0xa   :  { %28 = vsyncpa [#allocation4], 0 }
   0xb   :  { %30 = vsyncpa [#allocation4 + $0x1], 0  ;;  %s3537_s0 = smov 0   ;;  %s3539_s30 = smov 0  }
   0xc   :  { %s3541_s20 = smov 0   ;;  %s3543_s21 = smov 0  }
   0xd LB: > { %4389 = sst [smem:[#allocation8_spill]] %s3415_s0  ;;  %s3558_s1 = sadd.s32 4294967295, %s3427_s21   ;;  %s3427_s21 = sphi %s3543_s21, %s4414_s21   ;;  %s3423_s20 = sphi %s3541_s20, %s4416_s20   ;;  %s3419_s30 = sphi %s3539_s30, %s4418_s30   ;;  %s3415_s0 = sphi %s3537_s0, %s4417_s0  }
   0xe   : > { %4390 = sst [smem:[#allocation9_spill]] %s3423_s20  ;;  %s2770_s22 = sadd.s32 4294967294, %s3427_s21  }
   0xf   : > { %s3562_s2 = sadd.s32 1, %s3427_s21   ;;  %s43_s23 = sadd.s32 1, %s3423_s20 }
  0x10   : > { %4391 = sst [smem:[#allocation10_spill]] %s3562_s2  ;;  %s40_s24 = ssub.s32 %s3427_s21, %s3562_s2 }
  0x11   : > { %p50_p0 = scmp.ne.s32.totalorder %s3423_s20, %s3419_s30  ;;  %p41_p1 = scmp.eq.s32.totalorder %s40_s24, 0 }
  0x12   : > { %p51_p2 = scmp.eq.s32.totalorder %s3427_s21, 0  ;;  %p56_p3 = scmp.ne.s32.totalorder %s3419_s30, %s3415_s0 }
  0x13   : > { %p57_p4 = scmp.eq.s32.totalorder %s3558_s1, 0  ;;  %p442_p7 = scmp.eq.s32.totalorder %s3558_s1, 1 }
  0x14   : > { %s3574_s25 = scalar_select %p41_p1, %s3423_s20, %s43_s23  }
  0x15   : > { %p3576_p5 = por %p51_p2, %p50_p0  ;;  %p3580_p6 = por %p57_p4, %p56_p3 }
  0x16   : > { %4392 = sst [smem:[#allocation11_spill]] %s3574_s25  ;;  %p448_p8 = scmp.eq.s32.totalorder %s2770_s22, 1 }
  0x17   : > { %p3197_p10 = scmp.lt.s32.totalorder %s3427_s21, 2  ;;  %p3587_p11 = por %p442_p7, %p50_p0 }
  0x18   : > { %p3591_p12 = por %p448_p8, %p56_p3  ;;  %s542_s29 = sand.u32 1, %s3423_s20  }
  0x19   : > { %s4395_s27 = scalar_select %p3587_p11, 1, 0 }
  0x1a   : > { %s4397_s28 = scalar_select %p3591_p12, 1, 0 }
  0x1b   : > { %4396 = sst [smem:[#allocation12_spill]] %s4395_s27  ;;  %s2892_s23 = sshll.u32 %s3427_s21, 12 }
  0x1c   : > { %s2773_s24 = sshll.u32 %s542_s29, 8  ;;  %s4398_s0 = sld [smem:[#allocation13_spill]] }
  0x1d   : > { %s546_s22 = scalar_lea.vmem [#allocation2], %s2773_s24  ;;  %p3604_p13 = pnand %p3197_p10, %p3576_p5 }
  0x1e   : > { %s554_s15 = sshll.u32 %s546_s22, 4  ;;  %s3610_s20 = scalar_lea.sflag [#allocation3], %s542_s29  ;;  %s3608_s15 = int_to_ptr.vmem [resolvable:$true] %s554_s15 }
  0x1f   : > { %p3333_p1 = pneg %p3604_p13 }
  0x22   : > { %s4399_s18 = smov %s4398_s0  ;;  %s3600_s17 = scalar_lea.hbm %s4398_s0, %s2892_s23 }
  0x23   : > { %s3331_s2 = scalar_lea.hbm %s3600_s17, 4096  ;;  %s3336_s3 = scalar_lea.hbm %s4399_s18, 8192 }
  0x24   : > { %p3332_p0 = scmp.ne.s32.totalorder %s3600_s17, %s3331_s2  ;;  %p3337_p4 = scmp.lt.u32.totalorder %s3600_s17, %s4399_s18 }
  0x25   : > { %p3338_p5 = scmp.lt.u32.totalorder %s3336_s3, %s3331_s2  ;;  %p3340_p8 = scmp.lt.u32.totalorder %s3331_s2, %s3600_s17 }
  0x26   : > { %p3334_p2 = pnand %p3333_p1, %p3332_p0 }
  0x27   : > { %p3339_p7 = por %p3338_p5, %p3337_p4 }
  0x28   : > { %p3335_p3 = pneg %p3334_p2 }
  0x29   : > { %p3341_p10 = por %p3340_p8, %p3339_p7 }
  0x2b   : > { %p3342_p9 = pnand %p3341_p10, %p3335_p3 }
  0x2d   : > { %3345 = shalt.err (!%p3342_p9)
}
  0x2e   : > { %s3346_s29 = scalar_lea.vmem %s3608_s15, 4096  ;;  %s3429_s22 = smov [#allocation2]  }
  0x2f   : > { %p3347_p0 = scmp.ne.s32.totalorder %s3608_s15, %s3346_s29  ;;  %s3351_s0 = sshll.u32 %s3429_s22, 4  ;;  %s3352_s0 = int_to_ptr.vmem [resolvable:$false] %s3351_s0 }
  0x30   : > { %s3353_s25 = scalar_lea.vmem %s3352_s0, 8192  ;;  %p3354_p11 = scmp.lt.s32.totalorder %s3608_s15, %s3352_s0 }
  0x31   : > { %p3349_p2 = pnand %p3347_p0, %p3333_p1  ;;  %p3355_p4 = scmp.lt.s32.totalorder %s3353_s25, %s3346_s29 }
  0x33   : > { %p3350_p12 = pneg %p3349_p2  ;;  %p3356_p5 = por %p3355_p4, %p3354_p11 }
  0x35   : > { %p3357_p7 = pnand %p3356_p5, %p3350_p12 }
  0x37   : > { %3360 = shalt.err (!%p3357_p7)
}
  0x38   : > { %s3430_s2 = smov 256   ;;  %s3431_s3 = smov 16  }
  0x39   : > { %3192 = dma.hbm_to_vmem [thread:$0]  (!%p3604_p13), %s3600_s17, 4096, %s3608_s15, %s3610_s20, %s3430_s2, %s3430_s2, %s3431_s3  }
  0x3a   : > { %p2777_p9 = scmp.ge.s32.totalorder %s3427_s21, 1  ;;  %p571_p1 = scmp.lt.s32.totalorder %s3427_s21, 3 }
  0x3c   : > { %p572_p3 = pnand %p2777_p9, %p571_p1 }
  0x3d   : > { %s3641_s23 = sand.u32 (!%p572_p3), 1, %s3419_s30  }
  0x3e   : > { %575 = sbr.rel (%p572_p3) target bundleno = 2100 (0x834), region = 92  ;;  %s4380_s24 = sshll.u32 (!%p572_p3), %s3641_s23, 8 }
  0x3f   : > { %s578_s29 = scalar_lea.sflag (!%p572_p3), [#allocation3], %s3641_s23  ;;  %s3647_s22 = scalar_lea.vmem (!%p572_p3), [#allocation2], %s4380_s24 }
  0x45   : > { %3406 = dma.done.wait (%p3580_p6), %s578_s29, 4096  }
  0x46   : > { %3408 = vsyncadd (%p3580_p6), %s578_s29, 4294963200  ;;  %s4401_s20 = sld [smem:[#allocation15_spill]]  ;;  %v662_v11 = vld [vmem:[%s3647_s22 + $0x8] sm:$0xff]  ;;  %v664_v12 = vld [vmem:[%s3647_s22 + $0x18] sm:$0xff]  ;;  %s4403_s3 = sld [smem:[#allocation16_spill]] }
  0x47   : > { %v694_v13 = vpack.c.bf16 %v664_v12, %v662_v11  ;;  %v678_v15 = vld [vmem:[%s3647_s22 + $0x88] sm:$0xff]  ;;  %v680_v16 = vld [vmem:[%s3647_s22 + $0x98] sm:$0xff]  ;;  %v661_v22 = vld [vmem:[%s3647_s22] sm:$0xff]  ;;  %s2780_s0 = sshll.u32 %s3558_s1, 4  ;;  %s3432_s29 = smov 96  }
  0x48   : > { %v702_v18 = vpack.c.bf16 %v680_v16, %v678_v15  ;;  %v663_v23 = vld [vmem:[%s3647_s22 + $0x10] sm:$0xff]  ;;  %v666_v24 = vld [vmem:[%s3647_s22 + $0x28] sm:$0xff]  ;;  %v668_v25 = vld [vmem:[%s3647_s22 + $0x38] sm:$0xff]  ;;  %p648_p6 = scmp.lt.s32.totalorder %s2780_s0, 31  ;;  %s4404_s2 = sld [smem:[#allocation14_spill]] }
  0x49   : > { %876 = vmatprep.mubr.bf16.mxu0 %v694_v13  ;;  %v677_v26 = vld [vmem:[%s3647_s22 + $0x80] sm:$0xff]  ;;  %v679_v27 = vld [vmem:[%s3647_s22 + $0x90] sm:$0xff]  ;;  %v682_v28 = vld [vmem:[%s3647_s22 + $0xa8] sm:$0xff]  ;;  %v693_v31 = vpack.c.bf16 %v663_v23, %v661_v22  ;;  %v696_v32 = vpack.c.bf16 %v668_v25, %v666_v24  ;;  %s2894_s15 = sshll.u32 %s3558_s1, 12  ;;  %s4408_s17 = sld [smem:[#allocation12_spill]] }
  0x4a   : > { %908 = vmatprep.mubr.bf16.mxu1 %v702_v18  ;;  %v684_v29 = vld [vmem:[%s3647_s22 + $0xb8] sm:$0xff]  ;;  %v3253_v30 = vld [vmem:[%s4354_s4] sm:$0xff]   ;;  %v701_v33 = vpack.c.bf16 %v679_v27, %v677_v26  ;;  %v3254_v34 = vld [vmem:[%s4354_s4 + $0x8] sm:$0xff]   ;;  %s4420_s0 = smov (!%p648_p6, %s2780_s0), 31  ;;  %s4409_s25 = sld [smem:[#allocation19_spill]] }
  0x4b   : > { %v704_v35 = vpack.c.bf16 %v684_v29, %v682_v28  ;;  %v665_v36 = vld [vmem:[%s3647_s22 + $0x20] sm:$0xff]  ;;  %v667_v37 = vld [vmem:[%s3647_s22 + $0x30] sm:$0xff]  ;;  %v670_v38 = vld [vmem:[%s3647_s22 + $0x48] sm:$0xff]  ;;  %s2781_s18 = sshll.u32 %s4420_s0, 3  ;;  %s2637_s1 = scalar_lea.sflag [#allocation4], %s3641_s23 }
  0x4c   : > { %s4402_s27 = smov %s4401_s20  ;;  %v3237_v0 = vld [vmem:[%s4401_s20 + $0x40] sm:$0xff]   ;;  %v672_v39 = vld [vmem:[%s3647_s22 + $0x58] sm:$0xff]  ;;  %v683_v41 = vld [vmem:[%s3647_s22 + $0xb0] sm:$0xff]  ;;  %v695_v45 = vpack.c.bf16 %v667_v37, %v665_v36  ;;  %s3894_s26 = scalar_lea.vmem %s4369_s19, %s2781_s18 }
  0x4d   : > { %v3238_v1 = vld [vmem:[%s4402_s27] sm:$0xff]   ;;  %2895 = vmatprep.subr.bf16.mxu0 %v3237_v0  ;;  %v3239_v2 = vld [vmem:[%s4402_s27 + $0x48] sm:$0xff]   ;;  %3169 = vmatprep.subr.bf16.mxu1 %v3237_v0  ;;  %v3241_v4 = vld [vmem:[%s4402_s27 + $0x50] sm:$0xff]   ;;  %v698_v46 = vpack.c.bf16 %v672_v39, %v670_v38  ;;  %s3434_s0 = smov [#allocation5]  }
  0x4e   : > { %2896 = vmatpush3.bf16.msra.mxu0 %v3238_v1  ;;  %v3240_v3 = vld [vmem:[%s4402_s27 + $0x8] sm:$0xff]   ;;  %3177 = vmatpush3.bf16.msra.mxu1 %v3238_v1  ;;  %v3242_v5 = vld [vmem:[%s4402_s27 + $0x10] sm:$0xff]   ;;  %v3243_v6 = vld [vmem:[%s4402_s27 + $0x58] sm:$0xff]  }
  0x4f   : > { %2897 = vmatprep.subr.bf16.mxu0 %v3239_v2  ;;  %3170 = vmatprep.subr.bf16.mxu1 %v3239_v2  ;;  %v3244_v7 = vld [vmem:[%s4402_s27 + $0x18] sm:$0xff]   ;;  %v3245_v8 = vld [vmem:[%s4402_s27 + $0x60] sm:$0xff]   ;;  %v3247_v10 = vld [vmem:[%s4402_s27 + $0x68] sm:$0xff]   ;;  %p4410_p12 = scmp.ne.s32.totalorder %s4408_s17, 0 }
  0x50   : > { %v3246_v9 = vld [vmem:[%s4402_s27 + $0x20] sm:$0xff]   ;;  %v3248_v14 = vld [vmem:[%s4402_s27 + $0x28] sm:$0xff]   ;;  %v3249_v17 = vld [vmem:[%s4402_s27 + $0x70] sm:$0xff]  }
  0x51   : > { %v3250_v19 = vld [vmem:[%s4402_s27 + $0x30] sm:$0xff]   ;;  %v3251_v20 = vld [vmem:[%s4402_s27 + $0x78] sm:$0xff]   ;;  %v681_v40 = vld [vmem:[%s3647_s22 + $0xa0] sm:$0xff] }
  0x52   : > { %2898 = vmatpush3.bf16.msra.mxu0 %v3240_v3  ;;  %3178 = vmatpush3.bf16.msra.mxu1 %v3240_v3  ;;  %v3252_v21 = vld [vmem:[%s4402_s27 + $0x38] sm:$0xff]   ;;  %v686_v42 = vld [vmem:[%s3647_s22 + $0xc8] sm:$0xff]  ;;  %v3255_v44 = vld [vmem:[%s4354_s4 + $0x10] sm:$0xff]   ;;  %v703_v47 = vpack.c.bf16 %v683_v41, %v681_v40 }
  0x53   : > { %2899 = vmatprep.subr.bf16.mxu0 %v3241_v4  ;;  %3171 = vmatprep.subr.bf16.mxu1 %v3241_v4  ;;  %v688_v43 = vld [vmem:[%s3647_s22 + $0xd8] sm:$0xff]  ;;  %v669_v49 = vld [vmem:[%s3647_s22 + $0x40] sm:$0xff]  ;;  %v671_v50 = vld [vmem:[%s3647_s22 + $0x50] sm:$0xff] }
  0x54   : > { %v706_v48 = vpack.c.bf16 %v688_v43, %v686_v42  ;;  %v674_v51 = vld [vmem:[%s3647_s22 + $0x68] sm:$0xff]  ;;  %v676_v52 = vld [vmem:[%s3647_s22 + $0x78] sm:$0xff]  ;;  %v685_v53 = vld [vmem:[%s3647_s22 + $0xc0] sm:$0xff]  ;;  %v697_v57 = vpack.c.bf16 %v671_v50, %v669_v49 }
  0x55   : > { %v687_v54 = vld [vmem:[%s3647_s22 + $0xd0] sm:$0xff]  ;;  %v690_v55 = vld [vmem:[%s3647_s22 + $0xe8] sm:$0xff]  ;;  %v692_v56 = vld [vmem:[%s3647_s22 + $0xf8] sm:$0xff]  ;;  %v700_v58 = vpack.c.bf16 %v676_v52, %v674_v51 }
  0x56   : > { %2900 = vmatpush3.bf16.msra.mxu0 %v3242_v5  ;;  %3179 = vmatpush3.bf16.msra.mxu1 %v3242_v5  ;;  %v705_v59 = vpack.c.bf16 %v687_v54, %v685_v53  ;;  %v708_v60 = vpack.c.bf16 %v692_v56, %v690_v55  ;;  %v673_v61 = vld [vmem:[%s3647_s22 + $0x60] sm:$0xff]  ;;  %v675_v62 = vld [vmem:[%s3647_s22 + $0x70] sm:$0xff]  ;;  %v3256_v3 = vld [vmem:[%s4354_s4 + $0x18] sm:$0xff]  }
  0x57   : > { %2901 = vmatprep.subr.bf16.mxu0 %v3243_v6  ;;  %3172 = vmatprep.subr.bf16.mxu1 %v3243_v6  ;;  %v689_v63 = vld [vmem:[%s3647_s22 + $0xe0] sm:$0xff]  ;;  %v691_v0 = vld [vmem:[%s3647_s22 + $0xf0] sm:$0xff]  ;;  %v699_v1 = vpack.c.bf16 %v675_v62, %v673_v61  ;;  %v3258_v5 = vld [vmem:[%s4354_s4 + $0x28] sm:$0xff]  }
  0x58   : > { %v707_v2 = vpack.c.bf16 %v691_v0, %v689_v63  ;;  %v3257_v4 = vld [vmem:[%s4354_s4 + $0x20] sm:$0xff]   ;;  %v3259_v6 = vld [vmem:[%s4354_s4 + $0x30] sm:$0xff]  }
  0x5a   : > { %2902 = vmatpush3.bf16.msra.mxu0 %v3244_v7  ;;  %3180 = vmatpush3.bf16.msra.mxu1 %v3244_v7  ;;  %v3260_v7 = vld [vmem:[%s4354_s4 + $0x38] sm:$0xff]  }
  0x5b   : > { %2903 = vmatprep.subr.bf16.mxu0 %v3245_v8  ;;  %3173 = vmatprep.subr.bf16.mxu1 %v3245_v8  ;;  %v3760_v8 = vld [vmem:[%s4356_s6] sm:$0xff]  }
  0x5e   : > { %2904 = vmatpush3.bf16.msra.mxu0 %v3246_v9  ;;  %3181 = vmatpush3.bf16.msra.mxu1 %v3246_v9 }
  0x5f   : > { %2905 = vmatprep.subr.bf16.mxu0 %v3247_v10  ;;  %3174 = vmatprep.subr.bf16.mxu1 %v3247_v10  ;;  %v3766_v10 = vld [vmem:[%s4403_s3] ss:$0 sm:$0xff]  ;;  %s4035_s3 = scalar_lea.vmem %s4404_s2, %s2781_s18  ;;  %s4405_s2 = sld [smem:[#allocation17_spill]] }
  0x60   : > { %s4406_s18 = sld [smem:[#allocation18_spill]] }
  0x62   : > { %2906 = vmatpush3.bf16.msra.mxu0 %v3248_v14  ;;  %3182 = vmatpush3.bf16.msra.mxu1 %v3248_v14 }
  0x63   : > { %2907 = vmatprep.subr.bf16.mxu0 %v3249_v17  ;;  %3175 = vmatprep.subr.bf16.mxu1 %v3249_v17 }
  0x66   : > { %2908 = vmatpush3.bf16.msra.mxu0 %v3250_v19  ;;  %3183 = vmatpush3.bf16.msra.mxu1 %v3250_v19 }
  0x67   : > { %2909 = vmatprep.subr.bf16.mxu0 %v3251_v20  ;;  %3176 = vmatprep.subr.bf16.mxu1 %v3251_v20 }
  0x6a   : > { %2910 = vmatpush3.bf16.msra.mxu0 %v3252_v21  ;;  %3184 = vmatpush3.bf16.msra.mxu1 %v3252_v21 }
  0x6b   : > { %3029 = vmatprep.subr.bf16.mxu1 %v3253_v30 }
  0x6d   : > { %877 = vmatmul.mubr.bf16.vlgmr.msra.gmra.mrb[0].mxu0 %v693_v31  ;;  %909 = vmatmul.mubr.bf16.vlgmr.msra.gmra.mrb[0].mxu1 %v701_v33 }
  0x6e   : > { %884 = vmatprep.mubr.bf16.mxu0 %v696_v32  ;;  %916 = vmatprep.mubr.bf16.mxu1 %v704_v35 }
  0x6f   : > { %3030 = vmatpush3.bf16.msra.mxu1 %v3253_v30 }
  0x70   : > { %3031 = vmatprep.subr.bf16.mxu1 %v3254_v34 }
  0x73   : > { %3032 = vmatpush3.bf16.msra.mxu1 %v3254_v34 }
  0x74   : > { %3033 = vmatprep.subr.bf16.mxu1 %v3255_v44 }
  0x75   : > { %885 = vmatmul.mubr.bf16.gmra.mrb[4].mxu0 %v695_v45  ;;  %917 = vmatmul.mubr.bf16.gmra.mrb[4].mxu1 %v703_v47 }
  0x76   : > { %892 = vmatprep.mubr.bf16.mxu0 %v698_v46  ;;  %924 = vmatprep.mubr.bf16.mxu1 %v706_v48 }
  0x77   : > { %3034 = vmatpush3.bf16.msra.mxu1 %v3255_v44 }
  0x78   : > { %3035 = vmatprep.subr.bf16.mxu1 %v3256_v3 }
  0x7b   : > { %3036 = vmatpush3.bf16.msra.mxu1 %v3256_v3 }
  0x7c   : > { %3037 = vmatprep.subr.bf16.mxu1 %v3257_v4 }
  0x7d   : > { %893 = vmatmul.mubr.bf16.gmra.mrb[8].mxu0 %v697_v57  ;;  %925 = vmatmul.mubr.bf16.gmra.mrb[8].mxu1 %v705_v59 }
  0x7e   : > { %900 = vmatprep.mubr.bf16.mxu0 %v700_v58  ;;  %932 = vmatprep.mubr.bf16.mxu1 %v708_v60 }
  0x7f   : > { %3038 = vmatpush3.bf16.msra.mxu1 %v3257_v4 }
  0x80   : > { %3039 = vmatprep.subr.bf16.mxu1 %v3258_v5 }
  0x83   : > { %3040 = vmatpush3.bf16.msra.mxu1 %v3258_v5 }
  0x84   : > { %3041 = vmatprep.subr.bf16.mxu1 %v3259_v6 }
  0x85   : > { %901 = vmatmul.mubr.bf16.gmra.mrb[12].mxu0 %v699_v1  ;;  %933 = vmatmul.mubr.bf16.gmra.mrb[12].mxu1 %v707_v2 }
  0x87   : > { %3042 = vmatpush3.bf16.msra.mxu1 %v3259_v6  ;;  %v3262_v6 = vld [vmem:[%s4356_s6 + $0x8] sm:$0xff]  }
  0x88   : > { %3043 = vmatprep.subr.bf16.mxu1 %v3260_v7 }
  0x8b   : > { %3044 = vmatpush3.bf16.msra.mxu1 %v3260_v7 }
  0x8c   : > { %3061 = vmatprep.subr.bf16.mxu1 %v3760_v8 }
 0x140   : > { %v2911_v9 = vpop.f32.mrb[0].mxu0  ;;  %v2935_v12 = vpop.f32.mrb[0].mxu1 }
 0x141   : > { %v2912_v11 = vpop.f32.mrb[1].mxu0  ;;  %v2936_v15 = vpop.f32.mrb[1].mxu1 }
 0x142   : > { %v2913_v13 = vadd.f32 %v2912_v11, %v2911_v9  ;;  %v2914_v14 = vpop.f32.mrb[2].mxu0  ;;  %v2937_v17 = vadd.f32 %v2936_v15, %v2935_v12  ;;  %v2938_v18 = vpop.f32.mrb[2].mxu1 }
 0x143   : > { %v2915_v16 = vpop.f32.mrb[3].mxu0  ;;  %v2939_v21 = vpop.f32.mrb[3].mxu1 }
 0x144   : > { %v879_v19 = vadd.f32 %v2913_v13, %v3766_v10  ;;  %v2916_v20 = vadd.f32 %v2915_v16, %v2914_v14  ;;  %v911_v22 = vadd.f32 %v2937_v17, %v3766_v10  ;;  %v2940_v23 = vadd.f32 %v2939_v21, %v2938_v18 }
 0x146   : > { %v957_v24 = vmul.f32 0.1, %v879_v19  ;;  %v882_v25 = vadd.f32 %v2916_v20, %v3766_v10  ;;  %vm941_vm0 = vcmp.gt.f32.partialorder %v879_v19, 0.0  ;;  %vm949_vm1 = vcmp.gt.f32.partialorder %v911_v22, 0.0 }
 0x147   : > { %v965_v26 = vmul.f32 0.1, %v911_v22  ;;  %v914_v27 = vadd.f32 %v2940_v23, %v3766_v10 }
 0x148   : > { %vm942_vm2 = vcmp.gt.f32.partialorder %v882_v25, 0.0  ;;  %v958_v28 = vmul.f32 0.1, %v882_v25  ;;  %v2917_v29 = vpop.f32.mrb[4].mxu0  ;;  %v2941_v32 = vpop.f32.mrb[4].mxu1  ;;  %v973_v36 = vsel %vm941_vm0, %v879_v19, %v957_v24  ;;  %v3263_v19 = vld [vmem:[%s4356_s6 + $0x10] sm:$0xff]  }
 0x149   : > { %v2918_v30 = vpop.f32.mrb[5].mxu0  ;;  %vm950_vm3 = vcmp.gt.f32.partialorder %v914_v27, 0.0  ;;  %v966_v31 = vmul.f32 0.1, %v914_v27  ;;  %v3772_v33 = vsel %vm949_vm1, %v911_v22, %v965_v26  ;;  %v2942_v38 = vpop.f32.mrb[5].mxu1 }
 0x14a   : > { %v2919_v34 = vadd.f32 %v2918_v30, %v2917_v29  ;;  %v2920_v35 = vpop.f32.mrb[6].mxu0  ;;  %v974_v37 = vsel %vm942_vm2, %v882_v25, %v958_v28  ;;  %v2943_v41 = vadd.f32 %v2942_v38, %v2941_v32  ;;  %v2944_v42 = vpop.f32.mrb[6].mxu1 }
 0x14b   : > { %v2921_v39 = vpop.f32.mrb[7].mxu0  ;;  %v989_v40 = vpack.c.bf16 %v974_v37, %v973_v36  ;;  %v3774_v43 = vsel %vm950_vm3, %v914_v27, %v966_v31  ;;  %v2945_v46 = vpop.f32.mrb[7].mxu1 }
 0x14c   : > { %v887_v44 = vadd.f32 %v2919_v34, %v3766_v10  ;;  %v2922_v45 = vadd.f32 %v2921_v39, %v2920_v35  ;;  %v993_v47 = vpack.c.bf16 %v3774_v43, %v3772_v33  ;;  %v919_v48 = vadd.f32 %v2943_v41, %v3766_v10  ;;  %v3819_v33 = vld [vmem:[%s4355_s5] ss:$0 sm:$0xff] }
 0x14d   : > { %3045 = vmatprep.mubr.bf16.mxu1 %v989_v40  ;;  %v2946_v49 = vadd.f32 %v2945_v46, %v2944_v42 }
 0x14e   : > { %v959_v50 = vmul.f32 0.1, %v887_v44  ;;  %v890_v51 = vadd.f32 %v2922_v45, %v3766_v10  ;;  %vm943_vm4 = vcmp.gt.f32.partialorder %v887_v44, 0.0  ;;  %vm951_vm5 = vcmp.gt.f32.partialorder %v919_v48, 0.0 }
 0x14f   : > { %v967_v52 = vmul.f32 0.1, %v919_v48  ;;  %v922_v53 = vadd.f32 %v2946_v49, %v3766_v10 }
 0x150   : > { %vm944_vm6 = vcmp.gt.f32.partialorder %v890_v51, 0.0  ;;  %v960_v54 = vmul.f32 0.1, %v890_v51  ;;  %v2923_v55 = vpop.f32.mrb[8].mxu0  ;;  %v2947_v58 = vpop.f32.mrb[8].mxu1  ;;  %v975_v60 = vsel %vm943_vm4, %v887_v44, %v959_v50  ;;  %vm1260_vm4 = vcmask 523264  }
 0x151   : > { %v2924_v56 = vpop.f32.mrb[9].mxu0  ;;  %vm952_vm7 = vcmp.gt.f32.partialorder %v922_v53, 0.0  ;;  %v968_v57 = vmul.f32 0.1, %v922_v53  ;;  %v3782_v59 = vsel %vm951_vm5, %v919_v48, %v967_v52  ;;  %v2948_v0 = vpop.f32.mrb[9].mxu1 }
 0x152   : > { %v976_v61 = vsel %vm944_vm6, %v890_v51, %v960_v54  ;;  %v2925_v62 = vadd.f32 %v2924_v56, %v2923_v55  ;;  %v2926_v63 = vpop.f32.mrb[10].mxu0  ;;  %v2949_v3 = vadd.f32 %v2948_v0, %v2947_v58  ;;  %v2950_v4 = vpop.f32.mrb[10].mxu1  ;;  %v3265_v56 = vld [vmem:[%s4358_s8] sm:$0xff]  }
 0x153   : > { %v990_v1 = vpack.c.bf16 %v976_v61, %v975_v60  ;;  %v2927_v2 = vpop.f32.mrb[11].mxu0  ;;  %v3784_v5 = vsel %vm952_vm7, %v922_v53, %v968_v57  ;;  %v2951_v11 = vpop.f32.mrb[11].mxu1  ;;  %v3266_v57 = vld [vmem:[%s4358_s8 + $0x8] sm:$0xff]   ;;  %3085 = vmatprep.subr.bf16.mxu0 %v3265_v56 }
 0x154   : > { %v895_v7 = vadd.f32 %v2925_v62, %v3766_v10  ;;  %v2928_v9 = vadd.f32 %v2927_v2, %v2926_v63  ;;  %v994_v12 = vpack.c.bf16 %v3784_v5, %v3782_v59  ;;  %v927_v13 = vadd.f32 %v2949_v3, %v3766_v10  ;;  %3086 = vmatpush3.bf16.msra.mxu0 %v3265_v56 }
 0x155   : > { %3046 = vmatmul.mubr.bf16.vlgmr.msra.gmra.mrb[16].mxu1 %v990_v1  ;;  %v2952_v14 = vadd.f32 %v2951_v11, %v2950_v4  ;;  %3087 = vmatprep.subr.bf16.mxu0 %v3266_v57 }
 0x156   : > { %v961_v15 = vmul.f32 0.1, %v895_v7  ;;  %v898_v16 = vadd.f32 %v2928_v9, %v3766_v10  ;;  %3062 = vmatpush3.bf16.msra.mxu1 %v3760_v8  ;;  %vm945_vm8 = vcmp.gt.f32.partialorder %v895_v7, 0.0  ;;  %vm953_vm9 = vcmp.gt.f32.partialorder %v927_v13, 0.0 }
 0x157   : > { %v969_v17 = vmul.f32 0.1, %v927_v13  ;;  %v930_v18 = vadd.f32 %v2952_v14, %v3766_v10  ;;  %3063 = vmatprep.subr.bf16.mxu1 %v3262_v6 }
 0x158   : > { %vm946_vm10 = vcmp.gt.f32.partialorder %v898_v16, 0.0  ;;  %v962_v20 = vmul.f32 0.1, %v898_v16  ;;  %v2929_v21 = vpop.f32.mrb[12].mxu0  ;;  %v2953_v24 = vpop.f32.mrb[12].mxu1  ;;  %v977_v27 = vsel %vm945_vm8, %v895_v7, %v961_v15  ;;  %3088 = vmatpush3.bf16.msra.mxu0 %v3266_v57 }
 0x159   : > { %v2930_v22 = vpop.f32.mrb[13].mxu0  ;;  %vm954_vm11 = vcmp.gt.f32.partialorder %v930_v18, 0.0  ;;  %v970_v23 = vmul.f32 0.1, %v930_v18  ;;  %v985_v25 = vsel %vm953_vm9, %v927_v13, %v969_v17  ;;  %v2954_v29 = vpop.f32.mrb[13].mxu1 }
 0x15a   : > { %v2931_v26 = vadd.f32 %v2930_v22, %v2929_v21  ;;  %v2932_v8 = vpop.f32.mrb[14].mxu0  ;;  %v978_v28 = vsel %vm946_vm10, %v898_v16, %v962_v20  ;;  %3064 = vmatpush3.bf16.msra.mxu1 %v3262_v6  ;;  %v2955_v32 = vadd.f32 %v2954_v29, %v2953_v24  ;;  %v2956_v34 = vpop.f32.mrb[14].mxu1 }
 0x15b   : > { %v2933_v30 = vpop.f32.mrb[15].mxu0  ;;  %v991_v31 = vpack.c.bf16 %v978_v28, %v977_v27  ;;  %v986_v35 = vsel %vm954_vm11, %v930_v18, %v970_v23  ;;  %3065 = vmatprep.subr.bf16.mxu1 %v3263_v19  ;;  %v2957_v38 = vpop.f32.mrb[15].mxu1 }
 0x15c   : > { %v903_v36 = vadd.f32 %v2931_v26, %v3766_v10  ;;  %v2934_v37 = vadd.f32 %v2933_v30, %v2932_v8  ;;  %v995_v39 = vpack.c.bf16 %v986_v35, %v985_v25  ;;  %v935_v40 = vadd.f32 %v2955_v32, %v3766_v10 }
 0x15d   : > { %3049 = vmatprep.mubr.bf16.mxu1 %v991_v31  ;;  %v2958_v41 = vadd.f32 %v2957_v38, %v2956_v34 }
 0x15e   : > { %v963_v42 = vmul.f32 0.1, %v903_v36  ;;  %v906_v44 = vadd.f32 %v2934_v37, %v3766_v10  ;;  %3066 = vmatpush3.bf16.msra.mxu1 %v3263_v19  ;;  %vm947_vm12 = vcmp.gt.f32.partialorder %v903_v36, 0.0  ;;  %vm955_vm13 = vcmp.gt.f32.partialorder %v935_v40, 0.0 }
 0x15f   : > { %v971_v45 = vmul.f32 0.1, %v935_v40  ;;  %v938_v46 = vadd.f32 %v2958_v41, %v3766_v10  ;;  %v3264_v10 = vld [vmem:[%s4356_s6 + $0x18] sm:$0xff]  }
 0x160   : > { %vm948_vm14 = vcmp.gt.f32.partialorder %v906_v44, 0.0  ;;  %v964_v48 = vmul.f32 0.1, %v906_v44  ;;  %v979_v51 = vsel %vm947_vm12, %v903_v36, %v963_v42  ;;  %3067 = vmatprep.subr.bf16.mxu1 %v3264_v10 }
 0x161   : > { %vm956_vm15 = vcmp.gt.f32.partialorder %v938_v46, 0.0  ;;  %v972_v49 = vmul.f32 0.1, %v938_v46  ;;  %v987_v50 = vsel %vm955_vm13, %v935_v40, %v971_v45 }
 0x162   : > { %v980_v52 = vsel %vm948_vm14, %v906_v44, %v964_v48  ;;  %3068 = vmatpush3.bf16.msra.mxu1 %v3264_v10 }
 0x163   : > { %v992_v53 = vpack.c.bf16 %v980_v52, %v979_v51  ;;  %v988_v54 = vsel %vm956_vm15, %v938_v46, %v972_v49 }
 0x164   : > { %v996_v55 = vpack.c.bf16 %v988_v54, %v987_v50 }
 0x165   : > { %3050 = vmatmul.mubr.bf16.gmra.mrb[20].mxu1 %v992_v53 }
 0x166   : > { %3053 = vmatprep.mubr.bf16.mxu1 %v993_v47 }
 0x16d   : > { %3054 = vmatmul.mubr.bf16.gmra.mrb[24].mxu1 %v994_v12 }
 0x16e   : > { %3057 = vmatprep.mubr.bf16.mxu1 %v995_v39 }
 0x175   : > { %3058 = vmatmul.mubr.bf16.gmra.mrb[28].mxu1 %v996_v55 }
 0x228   : > { %v3047_v43 = vpop.f32.mrb[16].mxu1 }
 0x229   : > { %v1111_v47 = vadd.f32 %v3047_v43, %v3819_v33  ;;  %v1102_v58 = vpop.f32.mrb[17].mxu1 }
 0x22a   : > { %v1103_v59 = vadd.f32 %v3819_v33, %v1102_v58  ;;  %v3048_v60 = vpop.f32.mrb[18].mxu1 }
 0x22b   : > { %v1183_v61 = vmul.f32 0.1, %v1111_v47  ;;  %v1114_v62 = vadd.f32 %v3048_v60, %v3819_v33  ;;  %v1105_v63 = vpop.f32.mrb[19].mxu1  ;;  %vm1167_vm0 = vcmp.gt.f32.partialorder %v1111_v47, 0.0 }
 0x22c   : > { %v1181_v0 = vmul.f32 0.1, %v1103_v59  ;;  %v1106_v1 = vadd.f32 %v3819_v33, %v1105_v63  ;;  %vm1165_vm1 = vcmp.gt.f32.partialorder %v1103_v59, 0.0 }
 0x22d   : > { %vm1168_vm2 = vcmp.gt.f32.partialorder %v1114_v62, 0.0  ;;  %v1184_v2 = vmul.f32 0.1, %v1114_v62  ;;  %v1199_v4 = vsel %vm1167_vm0, %v1111_v47, %v1183_v61 }
 0x22e   : > { %vm1166_vm3 = vcmp.gt.f32.partialorder %v1106_v1, 0.0  ;;  %v1182_v3 = vmul.f32 0.1, %v1106_v1  ;;  %v1197_v6 = vsel %vm1165_vm1, %v1103_v59, %v1181_v0 }
 0x22f   : > { %v1200_v5 = vsel %vm1168_vm2, %v1114_v62, %v1184_v2 }
 0x230   : > { %v1214_v7 = vpack.c.bf16 %v1200_v5, %v1199_v4  ;;  %v1198_v9 = vsel %vm1166_vm3, %v1106_v1, %v1182_v3 }
 0x231   : > { %v1213_v11 = vpack.c.bf16 %v1198_v9, %v1197_v6 }
 0x233   : > { %3069 = vmatprep.mubr.msk.bf16.mxu1 %vm1260_vm4, %v1213_v11 }
 0x234   : > { %3070 = vmatmul.mubr.msk.bf16.vlgmr.msra.gmra.mrb[32].mxu1 %vm1260_vm4, %v1214_v7 }
 0x238   : > { %v3051_v12 = vpop.f32.mrb[20].mxu1 }
 0x239   : > { %v1127_v13 = vadd.f32 %v3051_v12, %v3819_v33  ;;  %v1118_v14 = vpop.f32.mrb[21].mxu1 }
 0x23a   : > { %v1119_v15 = vadd.f32 %v3819_v33, %v1118_v14  ;;  %v3052_v16 = vpop.f32.mrb[22].mxu1 }
 0x23b   : > { %v1187_v17 = vmul.f32 0.1, %v1127_v13  ;;  %v1130_v18 = vadd.f32 %v3052_v16, %v3819_v33  ;;  %v1121_v19 = vpop.f32.mrb[23].mxu1  ;;  %vm1171_vm5 = vcmp.gt.f32.partialorder %v1127_v13, 0.0 }
 0x23c   : > { %v1185_v20 = vmul.f32 0.1, %v1119_v15  ;;  %v1122_v21 = vadd.f32 %v3819_v33, %v1121_v19  ;;  %vm1169_vm6 = vcmp.gt.f32.partialorder %v1119_v15, 0.0 }
 0x23d   : > { %vm1172_vm7 = vcmp.gt.f32.partialorder %v1130_v18, 0.0  ;;  %v1188_v22 = vmul.f32 0.1, %v1130_v18  ;;  %v1203_v24 = vsel %vm1171_vm5, %v1127_v13, %v1187_v17 }
 0x23e   : > { %vm1170_vm8 = vcmp.gt.f32.partialorder %v1122_v21, 0.0  ;;  %v1186_v23 = vmul.f32 0.1, %v1122_v21  ;;  %v1201_v26 = vsel %vm1169_vm6, %v1119_v15, %v1185_v20  ;;  %vm1461_vm6 = vcmask 261120  }
 0x23f   : > { %v1204_v25 = vsel %vm1172_vm7, %v1130_v18, %v1188_v22 }
 0x240   : > { %v1216_v8 = vpack.c.bf16 %v1204_v25, %v1203_v24  ;;  %v1202_v27 = vsel %vm1170_vm8, %v1122_v21, %v1186_v23  ;;  %v3055_v28 = vpop.f32.mrb[24].mxu1 }
 0x241   : > { %v1215_v29 = vpack.c.bf16 %v1202_v27, %v1201_v26  ;;  %v1143_v30 = vadd.f32 %v3055_v28, %v3819_v33  ;;  %v1134_v31 = vpop.f32.mrb[25].mxu1 }
 0x242   : > { %v1135_v32 = vadd.f32 %v3819_v33, %v1134_v31  ;;  %v3056_v34 = vpop.f32.mrb[26].mxu1 }
 0x243   : > { %vm1175_vm9 = vcmp.gt.f32.partialorder %v1143_v30, 0.0  ;;  %v1191_v35 = vmul.f32 0.1, %v1143_v30  ;;  %v1146_v36 = vadd.f32 %v3056_v34, %v3819_v33  ;;  %v1137_v37 = vpop.f32.mrb[27].mxu1  ;;  %3073 = vmatprep.mubr.msk.bf16.mxu1 %vm1260_vm4, %v1215_v29 }
 0x244   : > { %v1189_v38 = vmul.f32 0.1, %v1135_v32  ;;  %v1138_v39 = vadd.f32 %v3819_v33, %v1137_v37  ;;  %3074 = vmatmul.mubr.msk.bf16.gmra.mrb[36].mxu1 %vm1260_vm4, %v1216_v8  ;;  %vm1173_vm10 = vcmp.gt.f32.partialorder %v1135_v32, 0.0 }
 0x245   : > { %v1207_v40 = vsel %vm1175_vm9, %v1143_v30, %v1191_v35  ;;  %vm1176_vm11 = vcmp.gt.f32.partialorder %v1146_v36, 0.0  ;;  %v1192_v41 = vmul.f32 0.1, %v1146_v36 }
 0x246   : > { %vm1174_vm12 = vcmp.gt.f32.partialorder %v1138_v39, 0.0  ;;  %v1190_v42 = vmul.f32 0.1, %v1138_v39  ;;  %v1205_v45 = vsel %vm1173_vm10, %v1135_v32, %v1189_v38 }
 0x247   : > { %v1208_v44 = vsel %vm1176_vm11, %v1146_v36, %v1192_v41 }
 0x248   : > { %v1218_v46 = vpack.c.bf16 %v1208_v44, %v1207_v40  ;;  %v1206_v48 = vsel %vm1174_vm12, %v1138_v39, %v1190_v42  ;;  %v3059_v49 = vpop.f32.mrb[28].mxu1 }
 0x249   : > { %v1217_v50 = vpack.c.bf16 %v1206_v48, %v1205_v45  ;;  %v1159_v51 = vadd.f32 %v3059_v49, %v3819_v33  ;;  %v1150_v52 = vpop.f32.mrb[29].mxu1 }
 0x24a   : > { %v1151_v53 = vadd.f32 %v3819_v33, %v1150_v52  ;;  %v3060_v54 = vpop.f32.mrb[30].mxu1 }
 0x24b   : > { %vm1179_vm13 = vcmp.gt.f32.partialorder %v1159_v51, 0.0  ;;  %v1195_v55 = vmul.f32 0.1, %v1159_v51  ;;  %v1162_v10 = vadd.f32 %v3060_v54, %v3819_v33  ;;  %v1153_v56 = vpop.f32.mrb[31].mxu1  ;;  %3077 = vmatprep.mubr.msk.bf16.mxu1 %vm1260_vm4, %v1217_v50 }
 0x24c   : > { %vm1177_vm14 = vcmp.gt.f32.partialorder %v1151_v53, 0.0  ;;  %v1193_v57 = vmul.f32 0.1, %v1151_v53  ;;  %v1154_v43 = vadd.f32 %v3819_v33, %v1153_v56  ;;  %3078 = vmatmul.mubr.msk.bf16.gmra.mrb[40].mxu1 %vm1260_vm4, %v1218_v46  ;;  %v3848_v33 = vld [vmem:[%s4357_s7] ss:$0 sm:$0xff] }
 0x24d   : > { %v1211_v47 = vsel %vm1179_vm13, %v1159_v51, %v1195_v55  ;;  %vm1180_vm15 = vcmp.gt.f32.partialorder %v1162_v10, 0.0  ;;  %v1196_v58 = vmul.f32 0.1, %v1162_v10 }
 0x24e   : > { %v1209_v59 = vsel %vm1177_vm14, %v1151_v53, %v1193_v57  ;;  %vm1178_vm0 = vcmp.gt.f32.partialorder %v1154_v43, 0.0  ;;  %v1194_v60 = vmul.f32 0.1, %v1154_v43 }
 0x24f   : > { %v1212_v61 = vsel %vm1180_vm15, %v1162_v10, %v1196_v58 }
 0x250   : > { %v1220_v62 = vpack.c.bf16 %v1212_v61, %v1211_v47  ;;  %v1210_v63 = vsel %vm1178_vm0, %v1154_v43, %v1194_v60 }
 0x251   : > { %v1219_v0 = vpack.c.bf16 %v1210_v63, %v1209_v59 }
 0x253   : > { %3081 = vmatprep.mubr.msk.bf16.mxu1 %vm1260_vm4, %v1219_v0 }
 0x254   : > { %3082 = vmatmul.mubr.msk.bf16.gmra.mrb[44].mxu1 %vm1260_vm4, %v1220_v62 }
 0x307   : > { %v3071_v1 = vpop.f32.mrb[32].mxu1 }
 0x308   : > { %v1328_v2 = vadd.f32 %v3071_v1, %v3848_v33  ;;  %v1319_v3 = vpop.f32.mrb[33].mxu1 }
 0x309   : > { %v1320_v4 = vadd.f32 %v3848_v33, %v1319_v3  ;;  %v3072_v5 = vpop.f32.mrb[34].mxu1 }
 0x30a   : > { %v1400_v6 = vmul.f32 0.1, %v1328_v2  ;;  %v1331_v7 = vadd.f32 %v3072_v5, %v3848_v33  ;;  %v1322_v9 = vpop.f32.mrb[35].mxu1  ;;  %vm1384_vm1 = vcmp.gt.f32.partialorder %v1328_v2, 0.0 }
 0x30b   : > { %v1398_v11 = vmul.f32 0.1, %v1320_v4  ;;  %v1323_v12 = vadd.f32 %v3848_v33, %v1322_v9  ;;  %vm1382_vm2 = vcmp.gt.f32.partialorder %v1320_v4, 0.0 }
 0x30c   : > { %vm1385_vm3 = vcmp.gt.f32.partialorder %v1331_v7, 0.0  ;;  %v1401_v13 = vmul.f32 0.1, %v1331_v7  ;;  %v1416_v15 = vsel %vm1384_vm1, %v1328_v2, %v1400_v6 }
 0x30d   : > { %vm1383_vm5 = vcmp.gt.f32.partialorder %v1323_v12, 0.0  ;;  %v1399_v14 = vmul.f32 0.1, %v1323_v12  ;;  %v1414_v17 = vsel %vm1382_vm2, %v1320_v4, %v1398_v11 }
 0x30e   : > { %v1417_v16 = vsel %vm1385_vm3, %v1331_v7, %v1401_v13  ;;  %v3887_v13 = vld [vmem:[%s4359_s9] ss:$0 sm:$0xff] }
 0x30f   : > { %v1431_v18 = vpack.c.bf16 %v1417_v16, %v1416_v15  ;;  %v1415_v19 = vsel %vm1383_vm5, %v1323_v12, %v1399_v14  ;;  %v3268_v12 = vld [vmem:[%s4360_s10 + $0x8] sm:$0xff]  }
 0x310   : > { %v1430_v20 = vpack.c.bf16 %v1415_v19, %v1414_v17 }
 0x312   : > { %3089 = vmatprep.mubr.msk.bf16.mxu0 %vm1461_vm6, %v1430_v20 }
 0x313   : > { %3090 = vmatmul.mubr.msk.bf16.vlgmr.msra.gmra.mrb[16].mxu0 %vm1461_vm6, %v1431_v18 }
 0x317   : > { %v3075_v21 = vpop.f32.mrb[36].mxu1 }
 0x318   : > { %v1344_v22 = vadd.f32 %v3075_v21, %v3848_v33  ;;  %v1335_v23 = vpop.f32.mrb[37].mxu1 }
 0x319   : > { %v1336_v24 = vadd.f32 %v3848_v33, %v1335_v23  ;;  %v3076_v25 = vpop.f32.mrb[38].mxu1 }
 0x31a   : > { %v1404_v26 = vmul.f32 0.1, %v1344_v22  ;;  %v1347_v8 = vadd.f32 %v3076_v25, %v3848_v33  ;;  %v1338_v27 = vpop.f32.mrb[39].mxu1  ;;  %vm1388_vm7 = vcmp.gt.f32.partialorder %v1344_v22, 0.0 }
 0x31b   : > { %v1402_v28 = vmul.f32 0.1, %v1336_v24  ;;  %v1339_v29 = vadd.f32 %v3848_v33, %v1338_v27  ;;  %vm1386_vm8 = vcmp.gt.f32.partialorder %v1336_v24, 0.0 }
 0x31c   : > { %vm1389_vm9 = vcmp.gt.f32.partialorder %v1347_v8, 0.0  ;;  %v1405_v30 = vmul.f32 0.1, %v1347_v8  ;;  %v1420_v32 = vsel %vm1388_vm7, %v1344_v22, %v1404_v26 }
 0x31d   : > { %vm1387_vm10 = vcmp.gt.f32.partialorder %v1339_v29, 0.0  ;;  %v1403_v31 = vmul.f32 0.1, %v1339_v29  ;;  %v1418_v35 = vsel %vm1386_vm8, %v1336_v24, %v1402_v28 }
 0x31e   : > { %v1421_v34 = vsel %vm1389_vm9, %v1347_v8, %v1405_v30 }
 0x31f   : > { %v1433_v36 = vpack.c.bf16 %v1421_v34, %v1420_v32  ;;  %v1419_v37 = vsel %vm1387_vm10, %v1339_v29, %v1403_v31  ;;  %v3079_v38 = vpop.f32.mrb[40].mxu1 }
 0x320   : > { %v1432_v39 = vpack.c.bf16 %v1419_v37, %v1418_v35  ;;  %v1360_v40 = vadd.f32 %v3079_v38, %v3848_v33  ;;  %v1351_v41 = vpop.f32.mrb[41].mxu1 }
 0x321   : > { %v1352_v42 = vadd.f32 %v3848_v33, %v1351_v41  ;;  %v3080_v44 = vpop.f32.mrb[42].mxu1 }
 0x322   : > { %v1408_v45 = vmul.f32 0.1, %v1360_v40  ;;  %v1363_v46 = vadd.f32 %v3080_v44, %v3848_v33  ;;  %v1354_v48 = vpop.f32.mrb[43].mxu1  ;;  %3093 = vmatprep.mubr.msk.bf16.mxu0 %vm1461_vm6, %v1432_v39  ;;  %vm1392_vm11 = vcmp.gt.f32.partialorder %v1360_v40, 0.0 }
 0x323   : > { %v1406_v49 = vmul.f32 0.1, %v1352_v42  ;;  %v1355_v50 = vadd.f32 %v3848_v33, %v1354_v48  ;;  %3094 = vmatmul.mubr.msk.bf16.gmra.mrb[20].mxu0 %vm1461_vm6, %v1433_v36  ;;  %vm1390_vm12 = vcmp.gt.f32.partialorder %v1352_v42, 0.0 }
 0x324   : > { %vm1393_vm13 = vcmp.gt.f32.partialorder %v1363_v46, 0.0  ;;  %v1409_v51 = vmul.f32 0.1, %v1363_v46  ;;  %v1424_v53 = vsel %vm1392_vm11, %v1360_v40, %v1408_v45 }
 0x325   : > { %vm1391_vm14 = vcmp.gt.f32.partialorder %v1355_v50, 0.0  ;;  %v1407_v52 = vmul.f32 0.1, %v1355_v50  ;;  %v1422_v55 = vsel %vm1390_vm12, %v1352_v42, %v1406_v49 }
 0x326   : > { %v1425_v54 = vsel %vm1393_vm13, %v1363_v46, %v1409_v51 }
 0x327   : > { %v1435_v10 = vpack.c.bf16 %v1425_v54, %v1424_v53  ;;  %v1423_v56 = vsel %vm1391_vm14, %v1355_v50, %v1407_v52  ;;  %v3083_v57 = vpop.f32.mrb[44].mxu1 }
 0x328   : > { %v1434_v43 = vpack.c.bf16 %v1423_v56, %v1422_v55  ;;  %v1376_v47 = vadd.f32 %v3083_v57, %v3848_v33  ;;  %v1367_v58 = vpop.f32.mrb[45].mxu1 }
 0x329   : > { %v1368_v59 = vadd.f32 %v3848_v33, %v1367_v58  ;;  %v3084_v60 = vpop.f32.mrb[46].mxu1 }
 0x32a   : > { %vm1396_vm15 = vcmp.gt.f32.partialorder %v1376_v47, 0.0  ;;  %v1412_v61 = vmul.f32 0.1, %v1376_v47  ;;  %v1379_v62 = vadd.f32 %v3084_v60, %v3848_v33  ;;  %v1370_v63 = vpop.f32.mrb[47].mxu1  ;;  %3097 = vmatprep.mubr.msk.bf16.mxu0 %vm1461_vm6, %v1434_v43 }
 0x32b   : > { %vm1394_vm0 = vcmp.gt.f32.partialorder %v1368_v59, 0.0  ;;  %v1410_v0 = vmul.f32 0.1, %v1368_v59  ;;  %v1371_v1 = vadd.f32 %v3848_v33, %v1370_v63  ;;  %3098 = vmatmul.mubr.msk.bf16.gmra.mrb[24].mxu0 %vm1461_vm6, %v1435_v10  ;;  %v3267_v33 = vld [vmem:[%s4360_s10] sm:$0xff]  }
 0x32c   : > { %v1428_v2 = vsel %vm1396_vm15, %v1376_v47, %v1412_v61  ;;  %vm1397_vm1 = vcmp.gt.f32.partialorder %v1379_v62, 0.0  ;;  %v1413_v3 = vmul.f32 0.1, %v1379_v62  ;;  %3105 = vmatprep.subr.bf16.mxu1 %v3267_v33 }
 0x32d   : > { %v1426_v4 = vsel %vm1394_vm0, %v1368_v59, %v1410_v0  ;;  %vm1395_vm2 = vcmp.gt.f32.partialorder %v1371_v1, 0.0  ;;  %v1411_v5 = vmul.f32 0.1, %v1371_v1  ;;  %3106 = vmatpush3.bf16.msra.mxu1 %v3267_v33 }
 0x32e   : > { %v1429_v6 = vsel %vm1397_vm1, %v1379_v62, %v1413_v3  ;;  %3107 = vmatprep.subr.bf16.mxu1 %v3268_v12 }
 0x32f   : > { %v1437_v7 = vpack.c.bf16 %v1429_v6, %v1428_v2  ;;  %v1427_v9 = vsel %vm1395_vm2, %v1371_v1, %v1411_v5 }
 0x330   : > { %v1436_v11 = vpack.c.bf16 %v1427_v9, %v1426_v4 }
 0x331   : > { %3108 = vmatpush3.bf16.msra.mxu1 %v3268_v12 }
 0x332   : > { %3101 = vmatprep.mubr.msk.bf16.mxu0 %vm1461_vm6, %v1436_v11 }
 0x333   : > { %3102 = vmatmul.mubr.msk.bf16.gmra.mrb[28].mxu0 %vm1461_vm6, %v1437_v7 }
 0x3e6   : > { %v3091_v14 = vpop.f32.mrb[16].mxu0 }
 0x3e7   : > { %v3897_v15 = vadd.f32 %v3091_v14, %v3887_v13  ;;  %v1520_v16 = vpop.f32.mrb[17].mxu0 }
 0x3e8   : > { %v3900_v17 = vadd.f32 %v3887_v13, %v1520_v16  ;;  %v3092_v18 = vpop.f32.mrb[18].mxu0 }
 0x3e9   : > { %v1601_v19 = vmul.f32 0.5, %v3897_v15  ;;  %2622 = vst.msk [vmem:[%s3894_s26 + $0x10] sm:$0xff] %vm1260_vm4, %v3897_v15  ;;  %v3907_v20 = vadd.f32 %v3092_v18, %v3887_v13  ;;  %v1523_v21 = vpop.f32.mrb[19].mxu0 }
 0x3ea   : > { %v1599_v22 = vmul.f32 0.5, %v3900_v17  ;;  %2620 = vst.msk [vmem:[%s3894_s26] sm:$0xff] %vm1260_vm4, %v3900_v17  ;;  %v3914_v23 = vadd.f32 %v3887_v13, %v1523_v21 }
 0x3eb   : > { %v1619_v24 = vmul.f32 1.442695, %v1601_v19  ;;  %v1602_v25 = vmul.f32 0.5, %v3907_v20  ;;  %2623 = vst.msk [vmem:[%s3894_s26 + $0x18] sm:$0xff] %vm1260_vm4, %v3907_v20 }
 0x3ec   : > { %v1615_v26 = vmul.f32 1.442695, %v1599_v22  ;;  %v1600_v8 = vmul.f32 0.5, %v3914_v23  ;;  %2621 = vst.msk [vmem:[%s3894_s26 + $0x8] sm:$0xff] %vm1260_vm4, %v3914_v23 }
 0x3ed   : > { %3299 = vpow2.f32 %v1619_v24  ;;  %v1621_v27 = vmul.f32 1.442695, %v1602_v25 }
 0x3ee   : > { %3301 = vpow2.f32 %v1615_v26  ;;  %v1617_v28 = vmul.f32 1.442695, %v1600_v8 }
 0x3ef   : > { %3303 = vpow2.f32 %v1621_v27 }
 0x3f0   : > { %3305 = vpow2.f32 %v1617_v28 }
 0x3f6   : > { %v3095_v29 = vpop.f32.mrb[20].mxu0 }
 0x3f7   : > { %v3300_v30 = vpop.eup %3299  ;;  %v3925_v31 = vadd.f32 %v3095_v29, %v3887_v13  ;;  %v1536_v32 = vpop.f32.mrb[21].mxu0 }
 0x3f8   : > { %v3302_v34 = vpop.eup %3301  ;;  %v3928_v35 = vadd.f32 %v3887_v13, %v1536_v32  ;;  %1667 = vrot.lane.b32.xlu1 %v3300_v30, %s3432_s29  ;;  %v3096_v36 = vpop.f32.mrb[22].mxu0  ;;  %v3269_v30 = vld [vmem:[%s4362_s12] sm:$0xff]   ;;  %v3270_v32 = vld [vmem:[%s4362_s12 + $0x8] sm:$0xff]  }
 0x3f9   : > { %2626 = vst.msk [vmem:[%s3894_s26 + $0x30] sm:$0xff] %vm1260_vm4, %v3925_v31  ;;  %v3935_v37 = vadd.f32 %v3096_v36, %v3887_v13  ;;  %v1539_v38 = vpop.f32.mrb[23].mxu0  ;;  %1663 = vrot.lane.b32.xlu0 %v3302_v34, %s3432_s29  ;;  %v1605_v39 = vmul.f32 0.5, %v3925_v31  ;;  %v3304_v42 = vpop.eup %3303  ;;  %3125 = vmatprep.subr.bf16.mxu0 %v3269_v30 }
 0x3fa   : > { %v1603_v40 = vmul.f32 0.5, %v3928_v35  ;;  %2624 = vst.msk [vmem:[%s3894_s26 + $0x20] sm:$0xff] %vm1260_vm4, %v3928_v35  ;;  %v3944_v41 = vadd.f32 %v3887_v13, %v1539_v38  ;;  %v3306_v44 = vpop.eup %3305  ;;  %3126 = vmatpush3.bf16.msra.mxu0 %v3269_v30 }
 0x3fb   : > { %2627 = vst.msk [vmem:[%s3894_s26 + $0x38] sm:$0xff] %vm1260_vm4, %v3935_v37  ;;  %v1606_v46 = vmul.f32 0.5, %v3935_v37  ;;  %v1627_v49 = vmul.f32 1.442695, %v1605_v39  ;;  %3127 = vmatprep.subr.bf16.mxu0 %v3270_v32 }
 0x3fc   : > { %v1623_v45 = vmul.f32 1.442695, %v1603_v40  ;;  %v1604_v48 = vmul.f32 0.5, %v3944_v41  ;;  %2625 = vst.msk [vmem:[%s3894_s26 + $0x28] sm:$0xff] %vm1260_vm4, %v3944_v41  ;;  %1669 = vrot.lane.b32.xlu1 %v3304_v42, %s3432_s29  ;;  %v1583_v40 = vld [vmem:[%s4035_s3] sm:$0xff] }
 0x3fd   : > { %1665 = vrot.lane.b32.xlu0 %v3306_v44, %s3432_s29  ;;  %v1629_v54 = vmul.f32 1.442695, %v1606_v46  ;;  %v1585_v44 = vld [vmem:[%s4035_s3 + $0x10] sm:$0xff]  ;;  %v1584_v46 = vld [vmem:[%s4035_s3 + $0x8] sm:$0xff] }
 0x3fe   : > { %3307 = vpow2.f32 %v1623_v45  ;;  %v1625_v50 = vmul.f32 1.442695, %v1604_v48  ;;  %v3099_v51 = vpop.f32.mrb[24].mxu0  ;;  %3128 = vmatpush3.bf16.msra.mxu0 %v3270_v32  ;;  %v1586_v45 = vld [vmem:[%s4035_s3 + $0x18] sm:$0xff] }
 0x3ff   : > { %v3957_v52 = vadd.f32 %v3099_v51, %v3887_v13  ;;  %v1552_v53 = vpop.f32.mrb[25].mxu0 }
 0x400   : > { %3309 = vpow2.f32 %v1625_v50  ;;  %v3960_v55 = vadd.f32 %v3887_v13, %v1552_v53  ;;  %v3100_v10 = vpop.f32.mrb[26].mxu0 }
 0x401   : > { %2630 = vst.msk [vmem:[%s3894_s26 + $0x50] sm:$0xff] %vm1260_vm4, %v3957_v52  ;;  %v3966_v56 = vadd.f32 %v3100_v10, %v3887_v13  ;;  %v1555_v57 = vpop.f32.mrb[27].mxu0  ;;  %3311 = vpow2.f32 %v1627_v49  ;;  %v1609_v43 = vmul.f32 0.5, %v3957_v52 }
 0x402   : > { %v1607_v47 = vmul.f32 0.5, %v3960_v55  ;;  %2628 = vst.msk [vmem:[%s3894_s26 + $0x40] sm:$0xff] %vm1260_vm4, %v3960_v55  ;;  %v3974_v58 = vadd.f32 %v3887_v13, %v1555_v57  ;;  %3313 = vpow2.f32 %v1629_v54 }
 0x403   : > { %2631 = vst.msk [vmem:[%s3894_s26 + $0x58] sm:$0xff] %vm1260_vm4, %v3966_v56  ;;  %v1610_v60 = vmul.f32 0.5, %v3966_v56  ;;  %v1635_v62 = vmul.f32 1.442695, %v1609_v43 }
 0x404   : > { %v1631_v59 = vmul.f32 1.442695, %v1607_v47  ;;  %v1608_v61 = vmul.f32 0.5, %v3974_v58  ;;  %2629 = vst.msk [vmem:[%s3894_s26 + $0x48] sm:$0xff] %vm1260_vm4, %v3974_v58 }
 0x405   : > { %v1637_v4 = vmul.f32 1.442695, %v1610_v60 }
 0x406   : > { %3315 = vpow2.f32 %v1631_v59  ;;  %v1633_v63 = vmul.f32 1.442695, %v1608_v61  ;;  %v3103_v0 = vpop.f32.mrb[28].mxu0  ;;  %v1587_v61 = vld [vmem:[%s4035_s3 + $0x20] sm:$0xff] }
 0x407   : > { %v3985_v1 = vadd.f32 %v3103_v0, %v3887_v13  ;;  %v1568_v2 = vpop.f32.mrb[29].mxu0 }
 0x408   : > { %v3308_v3 = vpop.eup %3307  ;;  %3317 = vpow2.f32 %v1633_v63  ;;  %v3988_v5 = vadd.f32 %v3887_v13, %v1568_v2  ;;  %v3104_v6 = vpop.f32.mrb[30].mxu0  ;;  %v1588_v63 = vld [vmem:[%s4035_s3 + $0x28] sm:$0xff]  ;;  %v1589_v2 = vld [vmem:[%s4035_s3 + $0x30] sm:$0xff] }
 0x409   : > { %2634 = vst.msk [vmem:[%s3894_s26 + $0x70] sm:$0xff] %vm1260_vm4, %v3985_v1  ;;  %v3994_v7 = vadd.f32 %v3104_v6, %v3887_v13  ;;  %v1571_v9 = vpop.f32.mrb[31].mxu0  ;;  %1671 = vrot.lane.b32.xlu0 %v3308_v3, %s3432_s29  ;;  %3319 = vpow2.f32 %v1635_v62  ;;  %v1613_v33 = vmul.f32 0.5, %v3985_v1 }
 0x40a   : > { %v3310_v11 = vpop.eup %3309  ;;  %v1611_v12 = vmul.f32 0.5, %v3988_v5  ;;  %2632 = vst.msk [vmem:[%s3894_s26 + $0x60] sm:$0xff] %vm1260_vm4, %v3988_v5  ;;  %v4003_v14 = vadd.f32 %v3887_v13, %v1571_v9  ;;  %3321 = vpow2.f32 %v1637_v4 }
 0x40b   : > { %2635 = vst.msk [vmem:[%s3894_s26 + $0x78] sm:$0xff] %vm1260_vm4, %v3994_v7  ;;  %1673 = vrot.lane.b32.xlu1 %v3310_v11, %s3432_s29  ;;  %v3312_v16 = vpop.eup %3311  ;;  %v1614_v19 = vmul.f32 0.5, %v3994_v7  ;;  %v1643_v13 = vmul.f32 1.442695, %v1613_v33  ;;  %v1591_v11 = vld [vmem:[%s4035_s3 + $0x40] sm:$0xff] }
 0x40c   : > { %v1639_v18 = vmul.f32 1.442695, %v1611_v12  ;;  %v1612_v21 = vmul.f32 0.5, %v4003_v14  ;;  %2633 = vst.msk [vmem:[%s3894_s26 + $0x68] sm:$0xff] %vm1260_vm4, %v4003_v14  ;;  %v3314_v22 = vpop.eup %3313  ;;  %s4407_s26 = sshll.u32 %s3641_s23, 8 }
 0x40d   : > { %1675 = vrot.lane.b32.xlu0 %v3312_v16, %s3432_s29  ;;  %v1645_v26 = vmul.f32 1.442695, %v1614_v19 }
 0x40e   : > { %3323 = vpow2.f32 %v1639_v18  ;;  %v1641_v24 = vmul.f32 1.442695, %v1612_v21  ;;  %v1592_v18 = vld [vmem:[%s4035_s3 + $0x48] sm:$0xff] }
 0x40f   : > { %1677 = vrot.lane.b32.xlu1 %v3314_v22, %s3432_s29 }
 0x410   : > { %v3316_v25 = vpop.eup %3315  ;;  %3325 = vpow2.f32 %v1641_v24 }
 0x411   : > { %1679 = vrot.lane.b32.xlu0 %v3316_v25, %s3432_s29  ;;  %3327 = vpow2.f32 %v1643_v13  ;;  %v1593_v13 = vld [vmem:[%s4035_s3 + $0x50] sm:$0xff] }
 0x412   : > { %v3318_v8 = vpop.eup %3317  ;;  %3329 = vpow2.f32 %v1645_v26  ;;  %v1594_v26 = vld [vmem:[%s4035_s3 + $0x58] sm:$0xff] }
 0x413   : > { %1681 = vrot.lane.b32.xlu1 %v3318_v8, %s3432_s29  ;;  %v3320_v27 = vpop.eup %3319 }
 0x414   : > { %v3322_v28 = vpop.eup %3321 }
 0x415   : > { %1683 = vrot.lane.b32.xlu0 %v3320_v27, %s3432_s29 }
 0x417   : > { %1685 = vrot.lane.b32.xlu1 %v3322_v28, %s3432_s29 }
 0x418   : > { %v3324_v29 = vpop.eup %3323 }
 0x419   : > { %1687 = vrot.lane.b32.xlu0 %v3324_v29, %s3432_s29 }
 0x41a   : > { %v3326_v34 = vpop.eup %3325 }
 0x41b   : > { %1689 = vrot.lane.b32.xlu1 %v3326_v34, %s3432_s29  ;;  %v3328_v36 = vpop.eup %3327  ;;  %v1596_v34 = vld [vmem:[%s4035_s3 + $0x68] sm:$0xff] }
 0x41c   : > { %v3330_v38 = vpop.eup %3329 }
 0x41d   : > { %1691 = vrot.lane.b32.xlu0 %v3328_v36, %s3432_s29 }
 0x41f   : > { %1693 = vrot.lane.b32.xlu1 %v3330_v38, %s3432_s29  ;;  %s4235_s29 = scalar_lea.vmem [#allocation5], %s4407_s26 }
 0x420   : > { %s2656_s22 = sshll.u32 %s4235_s29, 4  ;;  %s4302_s22 = int_to_ptr.vmem [resolvable:$true] %s2656_s22 }
 0x46a   : > { %v1668_v39 = vpop.permute.xlu1 %1667 }
 0x46b   : > { %v1664_v42 = vpop.permute.xlu0 %1663  ;;  %v1713_v50 = vmul.f32 %v1668_v39, %v1585_v44 }
 0x46c   : > { %v1711_v48 = vmul.f32 %v1664_v42, %v1583_v40  ;;  %v1597_v40 = vld [vmem:[%s4035_s3 + $0x70] sm:$0xff] }
 0x46d   : > { %v1729_v47 = vadd.f32 %v1713_v50, %v3897_v15 }
 0x46e   : > { %v1670_v49 = vpop.permute.xlu1 %1669  ;;  %v1727_v57 = vadd.f32 %v1711_v48, %v3900_v17 }
 0x46f   : > { %v1714_v51 = vmul.f32 %v1670_v49, %v1586_v45  ;;  %v1666_v53 = vpop.permute.xlu0 %1665  ;;  %v1598_v45 = vld [vmem:[%s4035_s3 + $0x78] sm:$0xff] }
 0x470   : > { %v1712_v54 = vmul.f32 %v1666_v53, %v1584_v46 }
 0x471   : > { %v1730_v10 = vadd.f32 %v1714_v51, %v3907_v20 }
 0x472   : > { %v1728_v43 = vadd.f32 %v1712_v54, %v3914_v23  ;;  %v1590_v23 = vld [vmem:[%s4035_s3 + $0x38] sm:$0xff] }
 0x473   : > { %v1744_v60 = vpack.c.bf16 %v1730_v10, %v1729_v47 }
 0x474   : > { %v1743_v59 = vpack.c.bf16 %v1728_v43, %v1727_v57 }
 0x476   : > { %3109 = vmatprep.mubr.msk.bf16.mxu1 %vm1461_vm6, %v1743_v59 }
 0x477   : > { %3110 = vmatmul.mubr.msk.bf16.vlgmr.msra.gmra.mrb[48].mxu1 %vm1461_vm6, %v1744_v60 }
 0x47b   : > { %v1672_v62 = vpop.permute.xlu0 %1671 }
 0x47c   : > { %v1715_v0 = vmul.f32 %v1672_v62, %v1587_v61 }
 0x47d   : > { %v1674_v20 = vpop.permute.xlu1 %1673 }
 0x47e   : > { %v1716_v3 = vmul.f32 %v1674_v20, %v1588_v63  ;;  %v1731_v15 = vadd.f32 %v1715_v0, %v3928_v35 }
 0x47f   : > { %v1676_v17 = vpop.permute.xlu0 %1675 }
 0x480   : > { %v1732_v4 = vadd.f32 %v1716_v3, %v3944_v41  ;;  %v1717_v6 = vmul.f32 %v1676_v17, %v1589_v2 }
 0x481   : > { %v1678_v9 = vpop.permute.xlu1 %1677 }
 0x482   : > { %v1745_v33 = vpack.c.bf16 %v1732_v4, %v1731_v15  ;;  %v1718_v12 = vmul.f32 %v1678_v9, %v1590_v23  ;;  %v1733_v19 = vadd.f32 %v1717_v6, %v3925_v31 }
 0x483   : > { %v1680_v16 = vpop.permute.xlu0 %1679 }
 0x484   : > { %v1734_v21 = vadd.f32 %v1718_v12, %v3935_v37  ;;  %v1719_v22 = vmul.f32 %v1680_v16, %v1591_v11  ;;  %3113 = vmatprep.mubr.msk.bf16.mxu1 %vm1461_vm6, %v1745_v33  ;;  %v1595_v37 = vld [vmem:[%s4035_s3 + $0x60] sm:$0xff]  ;;  %s3361_s3 = scalar_lea.vmem %s4302_s22, 4096 }
 0x485   : > { %v1682_v35 = vpop.permute.xlu1 %1681  ;;  %p3362_p11 = scmp.ne.s32.totalorder %s4302_s22, %s3361_s3 }
 0x486   : > { %v1746_v41 = vpack.c.bf16 %v1734_v21, %v1733_v19  ;;  %v1720_v24 = vmul.f32 %v1682_v35, %v1592_v18  ;;  %v1735_v8 = vadd.f32 %v1719_v22, %v3960_v55 }
 0x487   : > { %v1684_v25 = vpop.permute.xlu0 %1683  ;;  %p3363_p13 = pnand %p3362_p11, %p4410_p12 }
 0x488   : > { %v1736_v27 = vadd.f32 %v1720_v24, %v3974_v58  ;;  %v1721_v28 = vmul.f32 %v1684_v25, %v1593_v13  ;;  %3114 = vmatmul.mubr.msk.bf16.gmra.mrb[52].mxu1 %vm1461_vm6, %v1746_v41 }
 0x489   : > { %v1686_v31 = vpop.permute.xlu1 %1685  ;;  %p3364_p8 = pneg %p3363_p13 }
 0x48a   : > { %v1747_v29 = vpack.c.bf16 %v1736_v27, %v1735_v8  ;;  %v1722_v30 = vmul.f32 %v1686_v31, %v1594_v26  ;;  %v1737_v36 = vadd.f32 %v1721_v28, %v3957_v52 }
 0x48b   : > { %v1688_v32 = vpop.permute.xlu0 %1687 }
 0x48c   : > { %v1738_v38 = vadd.f32 %v1722_v30, %v3966_v56  ;;  %v1723_v39 = vmul.f32 %v1688_v32, %v1595_v37  ;;  %3117 = vmatprep.mubr.msk.bf16.mxu1 %vm1461_vm6, %v1747_v29 }
 0x48d   : > { %v1690_v55 = vpop.permute.xlu1 %1689 }
 0x48e   : > { %v1748_v58 = vpack.c.bf16 %v1738_v38, %v1737_v36  ;;  %v1724_v42 = vmul.f32 %v1690_v55, %v1596_v34  ;;  %v1739_v46 = vadd.f32 %v1723_v39, %v3988_v5  ;;  %v3271_v5 = vld [vmem:[%s4364_s14] sm:$0xff]  }
 0x48f   : > { %v1692_v44 = vpop.permute.xlu0 %1691  ;;  %3145 = vmatprep.subr.bf16.mxu1 %v3271_v5 }
 0x490   : > { %v1740_v48 = vadd.f32 %v1724_v42, %v4003_v14  ;;  %v1725_v49 = vmul.f32 %v1692_v44, %v1597_v40  ;;  %3118 = vmatmul.mubr.msk.bf16.gmra.mrb[56].mxu1 %vm1461_vm6, %v1748_v58  ;;  %v3272_v14 = vld [vmem:[%s4364_s14 + $0x8] sm:$0xff]  }
 0x491   : > { %v1694_v50 = vpop.permute.xlu1 %1693  ;;  %3146 = vmatpush3.bf16.msra.mxu1 %v3271_v5 }
 0x492   : > { %v1749_v52 = vpack.c.bf16 %v1740_v48, %v1739_v46  ;;  %v1726_v51 = vmul.f32 %v1694_v50, %v1598_v45  ;;  %v1741_v56 = vadd.f32 %v1725_v49, %v3985_v1  ;;  %3147 = vmatprep.subr.bf16.mxu1 %v3272_v14  ;;  %v3273_v1 = vld [vmem:[%s4364_s14 + $0x10] sm:$0xff]  }
 0x494   : > { %v1742_v53 = vadd.f32 %v1726_v51, %v3994_v7  ;;  %3121 = vmatprep.mubr.msk.bf16.mxu1 %vm1461_vm6, %v1749_v52  ;;  %v4089_v7 = vld [vmem:[%s4361_s11] ss:$0 sm:$0xff] }
 0x495   : > { %3148 = vmatpush3.bf16.msra.mxu1 %v3272_v14 }
 0x496   : > { %v1750_v54 = vpack.c.bf16 %v1742_v53, %v1741_v56  ;;  %3149 = vmatprep.subr.bf16.mxu1 %v3273_v1 }
 0x498   : > { %3122 = vmatmul.mubr.msk.bf16.gmra.mrb[60].mxu1 %vm1461_vm6, %v1750_v54 }
 0x499   : > { %3150 = vmatpush3.bf16.msra.mxu1 %v3273_v1 }
 0x54a   : > { %v3111_v10 = vpop.f32.mrb[48].mxu1 }
 0x54b   : > { %v1841_v57 = vadd.f32 %v3111_v10, %v4089_v7  ;;  %v1832_v43 = vpop.f32.mrb[49].mxu1 }
 0x54c   : > { %v1833_v47 = vadd.f32 %v4089_v7, %v1832_v43  ;;  %v3112_v59 = vpop.f32.mrb[50].mxu1 }
 0x54d   : > { %v1913_v60 = vmul.f32 0.1, %v1841_v57  ;;  %v1844_v61 = vadd.f32 %v3112_v59, %v4089_v7  ;;  %v1835_v62 = vpop.f32.mrb[51].mxu1  ;;  %vm1897_vm3 = vcmp.gt.f32.partialorder %v1841_v57, 0.0 }
 0x54e   : > { %v1911_v63 = vmul.f32 0.1, %v1833_v47  ;;  %v1836_v0 = vadd.f32 %v4089_v7, %v1835_v62  ;;  %vm1895_vm5 = vcmp.gt.f32.partialorder %v1833_v47, 0.0 }
 0x54f   : > { %vm1898_vm7 = vcmp.gt.f32.partialorder %v1844_v61, 0.0  ;;  %v1914_v20 = vmul.f32 0.1, %v1844_v61  ;;  %v1929_v3 = vsel %vm1897_vm3, %v1841_v57, %v1913_v60 }
 0x550   : > { %vm1896_vm8 = vcmp.gt.f32.partialorder %v1836_v0, 0.0  ;;  %v1912_v2 = vmul.f32 0.1, %v1836_v0  ;;  %v1927_v23 = vsel %vm1895_vm5, %v1833_v47, %v1911_v63 }
 0x551   : > { %v1930_v17 = vsel %vm1898_vm7, %v1844_v61, %v1914_v20  ;;  %v3277_v20 = vld [vmem:[%s4366_s16 + $0x4] ss:$8 sps:$4 sm:$0xff]  }
 0x552   : > { %v1944_v15 = vpack.c.bf16 %v1930_v17, %v1929_v3  ;;  %v1928_v4 = vsel %vm1896_vm8, %v1836_v0, %v1912_v2  ;;  %v3275_v0 = vld [vmem:[%s4366_s16] ss:$8 sps:$4 sm:$0xff]   ;;  %v3280_v2 = vld [vmem:[%s4366_s16 + $0x14] ss:$8 sps:$4 sm:$0xff]   ;;  %2475 = vmatprep.subr.bf16.mxu0 %v3277_v20  ;;  %v3278_v3 = vld [vmem:[%s4366_s16 + $0x10] ss:$8 sps:$4 sm:$0xff]  }
 0x553   : > { %v1943_v6 = vpack.c.bf16 %v1928_v4, %v1927_v23  ;;  %v3283_v17 = vld [vmem:[%s4366_s16 + $0x24] ss:$8 sps:$4 sm:$0xff]   ;;  %v3281_v23 = vld [vmem:[%s4366_s16 + $0x20] ss:$8 sps:$4 sm:$0xff]   ;;  %v3284_v4 = vld [vmem:[%s4366_s16 + $0x30] ss:$8 sps:$4 sm:$0xff]  }
 0x555   : > { %3129 = vmatprep.mubr.msk.bf16.mxu0 %vm1461_vm6, %v1943_v6  ;;  %v3289_v6 = vld [vmem:[%s4366_s16 + $0x44] ss:$8 sps:$4 sm:$0xff]  }
 0x556   : > { %3130 = vmatmul.mubr.msk.bf16.vlgmr.msra.gmra.mrb[32].mxu0 %vm1461_vm6, %v1944_v15  ;;  %v3286_v15 = vld [vmem:[%s4366_s16 + $0x34] ss:$8 sps:$4 sm:$0xff]  }
 0x557   : > { %2476 = vmatpush1.bf16.msra.mxu0 %v3275_v0 }
 0x558   : > { %2477 = vmatprep.subr.bf16.mxu0 %v3280_v2 }
 0x55b   : > { %v3115_v9 = vpop.f32.mrb[52].mxu1  ;;  %2478 = vmatpush1.bf16.msra.mxu0 %v3278_v3 }
 0x55c   : > { %v1857_v11 = vadd.f32 %v3115_v9, %v4089_v7  ;;  %v1848_v33 = vpop.f32.mrb[53].mxu1  ;;  %2479 = vmatprep.subr.bf16.mxu0 %v3283_v17  ;;  %v3287_v9 = vld [vmem:[%s4366_s16 + $0x40] ss:$8 sps:$4 sm:$0xff]  }
 0x55d   : > { %v1849_v12 = vadd.f32 %v4089_v7, %v1848_v33  ;;  %v3116_v16 = vpop.f32.mrb[54].mxu1  ;;  %v3290_v33 = vld [vmem:[%s4366_s16 + $0x50] ss:$8 sps:$4 sm:$0xff]  }
 0x55e   : > { %v1917_v18 = vmul.f32 0.1, %v1857_v11  ;;  %v1860_v19 = vadd.f32 %v3116_v16, %v4089_v7  ;;  %v1851_v21 = vpop.f32.mrb[55].mxu1  ;;  %vm1901_vm9 = vcmp.gt.f32.partialorder %v1857_v11, 0.0 }
 0x55f   : > { %v1915_v22 = vmul.f32 0.1, %v1849_v12  ;;  %v1852_v35 = vadd.f32 %v4089_v7, %v1851_v21  ;;  %vm1899_vm10 = vcmp.gt.f32.partialorder %v1849_v12, 0.0  ;;  %2480 = vmatpush1.bf16.msra.mxu0 %v3281_v23 }
 0x560   : > { %vm1902_vm11 = vcmp.gt.f32.partialorder %v1860_v19, 0.0  ;;  %v1918_v13 = vmul.f32 0.1, %v1860_v19  ;;  %v1933_v24 = vsel %vm1901_vm9, %v1857_v11, %v1917_v18  ;;  %2481 = vmatprep.subr.bf16.mxu0 %v3286_v15  ;;  %v3292_v11 = vld [vmem:[%s4366_s16 + $0x54] ss:$8 sps:$4 sm:$0xff]  }
 0x561   : > { %vm1900_vm12 = vcmp.gt.f32.partialorder %v1852_v35, 0.0  ;;  %v1916_v41 = vmul.f32 0.1, %v1852_v35  ;;  %v1931_v26 = vsel %vm1899_vm10, %v1849_v12, %v1915_v22  ;;  %v4157_v12 = vld [vmem:[%s4363_s13] ss:$0 sm:$0xff] }
 0x562   : > { %v1934_v25 = vsel %vm1902_vm11, %v1860_v19, %v1918_v13 }
 0x563   : > { %v1946_v8 = vpack.c.bf16 %v1934_v25, %v1933_v24  ;;  %v1932_v27 = vsel %vm1900_vm12, %v1852_v35, %v1916_v41  ;;  %v3119_v28 = vpop.f32.mrb[56].mxu1  ;;  %2482 = vmatpush1.bf16.msra.mxu0 %v3284_v4 }
 0x564   : > { %v1945_v31 = vpack.c.bf16 %v1932_v27, %v1931_v26  ;;  %v1873_v37 = vadd.f32 %v3119_v28, %v4089_v7  ;;  %v1864_v29 = vpop.f32.mrb[57].mxu1  ;;  %2483 = vmatprep.subr.bf16.mxu0 %v3289_v6 }
 0x565   : > { %v1865_v30 = vadd.f32 %v4089_v7, %v1864_v29  ;;  %v3120_v32 = vpop.f32.mrb[58].mxu1 }
 0x566   : > { %v1921_v34 = vmul.f32 0.1, %v1873_v37  ;;  %v1876_v36 = vadd.f32 %v3120_v32, %v4089_v7  ;;  %v1867_v38 = vpop.f32.mrb[59].mxu1  ;;  %3133 = vmatprep.mubr.msk.bf16.mxu0 %vm1461_vm6, %v1945_v31  ;;  %vm1905_vm13 = vcmp.gt.f32.partialorder %v1873_v37, 0.0 }
 0x567   : > { %v1919_v39 = vmul.f32 0.1, %v1865_v30  ;;  %v1868_v55 = vadd.f32 %v4089_v7, %v1867_v38  ;;  %3134 = vmatmul.mubr.msk.bf16.gmra.mrb[36].mxu0 %vm1461_vm6, %v1946_v8  ;;  %vm1903_vm14 = vcmp.gt.f32.partialorder %v1865_v30, 0.0 }
 0x568   : > { %vm1906_vm15 = vcmp.gt.f32.partialorder %v1876_v36, 0.0  ;;  %v1922_v40 = vmul.f32 0.1, %v1876_v36  ;;  %v1937_v42 = vsel %vm1905_vm13, %v1873_v37, %v1921_v34  ;;  %2484 = vmatpush1.bf16.msra.mxu0 %v3287_v9 }
 0x569   : > { %vm1904_vm0 = vcmp.gt.f32.partialorder %v1868_v55, 0.0  ;;  %v1920_v58 = vmul.f32 0.1, %v1868_v55  ;;  %v1935_v45 = vsel %vm1903_vm14, %v1865_v30, %v1919_v39  ;;  %2485 = vmatprep.subr.bf16.mxu0 %v3292_v11 }
 0x56a   : > { %v1938_v44 = vsel %vm1906_vm15, %v1876_v36, %v1922_v40 }
 0x56b   : > { %v1948_v46 = vpack.c.bf16 %v1938_v44, %v1937_v42  ;;  %v1936_v48 = vsel %vm1904_vm0, %v1868_v55, %v1920_v58  ;;  %v3123_v49 = vpop.f32.mrb[60].mxu1 }
 0x56c   : > { %v1947_v50 = vpack.c.bf16 %v1936_v48, %v1935_v45  ;;  %v1889_v52 = vadd.f32 %v3123_v49, %v4089_v7  ;;  %v1880_v51 = vpop.f32.mrb[61].mxu1  ;;  %2486 = vmatpush1.bf16.msra.mxu0 %v3290_v33 }
 0x56d   : > { %v1881_v56 = vadd.f32 %v4089_v7, %v1880_v51  ;;  %v3124_v53 = vpop.f32.mrb[62].mxu1 }
 0x56e   : > { %v1925_v54 = vmul.f32 0.1, %v1889_v52  ;;  %v1892_v5 = vadd.f32 %v3124_v53, %v4089_v7  ;;  %v1883_v14 = vpop.f32.mrb[63].mxu1  ;;  %3137 = vmatprep.mubr.msk.bf16.mxu0 %vm1461_vm6, %v1947_v50  ;;  %vm1909_vm1 = vcmp.gt.f32.partialorder %v1889_v52, 0.0 }
 0x56f   : > { %v1923_v1 = vmul.f32 0.1, %v1881_v56  ;;  %v1884_v10 = vadd.f32 %v4089_v7, %v1883_v14  ;;  %3138 = vmatmul.mubr.msk.bf16.gmra.mrb[40].mxu0 %vm1461_vm6, %v1948_v46  ;;  %vm1907_vm2 = vcmp.gt.f32.partialorder %v1881_v56, 0.0  ;;  %v3274_v7 = vld [vmem:[%s4364_s14 + $0x18] sm:$0xff]  }
 0x570   : > { %vm1910_vm3 = vcmp.gt.f32.partialorder %v1892_v5, 0.0  ;;  %v1926_v57 = vmul.f32 0.1, %v1892_v5  ;;  %v1941_v47 = vsel %vm1909_vm1, %v1889_v52, %v1925_v54  ;;  %3151 = vmatprep.subr.bf16.mxu1 %v3274_v7 }
 0x571   : > { %vm1908_vm5 = vcmp.gt.f32.partialorder %v1884_v10, 0.0  ;;  %v1924_v43 = vmul.f32 0.1, %v1884_v10  ;;  %v1939_v60 = vsel %vm1907_vm2, %v1881_v56, %v1923_v1  ;;  %3152 = vmatpush3.bf16.msra.mxu1 %v3274_v7 }
 0x572   : > { %v1942_v59 = vsel %vm1910_vm3, %v1892_v5, %v1926_v57 }
 0x573   : > { %v1950_v61 = vpack.c.bf16 %v1942_v59, %v1941_v47  ;;  %v1940_v62 = vsel %vm1908_vm5, %v1884_v10, %v1924_v43 }
 0x574   : > { %v1949_v63 = vpack.c.bf16 %v1940_v62, %v1939_v60 }
 0x576   : > { %3141 = vmatprep.mubr.msk.bf16.mxu0 %vm1461_vm6, %v1949_v63 }
 0x577   : > { %3142 = vmatmul.mubr.msk.bf16.gmra.mrb[44].mxu0 %vm1461_vm6, %v1950_v61 }
 0x629   : > { %v3131_v16 = vpop.f32.mrb[32].mxu0 }
 0x62a   : > { %v2041_v18 = vadd.f32 %v3131_v16, %v4157_v12  ;;  %v2032_v19 = vpop.f32.mrb[33].mxu0 }
 0x62b   : > { %v2033_v21 = vadd.f32 %v4157_v12, %v2032_v19  ;;  %v3132_v22 = vpop.f32.mrb[34].mxu0 }
 0x62c   : > { %v2113_v35 = vmul.f32 0.1, %v2041_v18  ;;  %v2044_v13 = vadd.f32 %v3132_v22, %v4157_v12  ;;  %v2035_v41 = vpop.f32.mrb[35].mxu0  ;;  %vm2097_vm6 = vcmp.gt.f32.partialorder %v2041_v18, 0.0 }
 0x62d   : > { %v2111_v24 = vmul.f32 0.1, %v2033_v21  ;;  %v2036_v25 = vadd.f32 %v4157_v12, %v2035_v41  ;;  %vm2095_vm7 = vcmp.gt.f32.partialorder %v2033_v21, 0.0 }
 0x62e   : > { %vm2098_vm8 = vcmp.gt.f32.partialorder %v2044_v13, 0.0  ;;  %v2114_v26 = vmul.f32 0.1, %v2044_v13  ;;  %v2129_v27 = vsel %vm2097_vm6, %v2041_v18, %v2113_v35 }
 0x62f   : > { %vm2096_vm9 = vcmp.gt.f32.partialorder %v2036_v25, 0.0  ;;  %v2112_v8 = vmul.f32 0.1, %v2036_v25  ;;  %v2127_v31 = vsel %vm2095_vm7, %v2033_v21, %v2111_v24 }
 0x630   : > { %v2130_v28 = vsel %vm2098_vm8, %v2044_v13, %v2114_v26  ;;  %v3298_v26 = vld [vmem:[%s4366_s16 + $0x74] ss:$8 sps:$4 sm:$0xff]  }
 0x631   : > { %v2144_v37 = vpack.c.bf16 %v2130_v28, %v2129_v27  ;;  %v2128_v29 = vsel %vm2096_vm9, %v2036_v25, %v2112_v8  ;;  %v3293_v25 = vld [vmem:[%s4366_s16 + $0x60] ss:$8 sps:$4 sm:$0xff]   ;;  %v3296_v8 = vld [vmem:[%s4366_s16 + $0x70] ss:$8 sps:$4 sm:$0xff]   ;;  %v3433_v27 = vmov 0  }
 0x632   : > { %v2143_v30 = vpack.c.bf16 %v2128_v29, %v2127_v31  ;;  %2507 = vmatprep.mubr.bf16.mxu0 %v3433_v27  ;;  %v4199_v28 = vld [vmem:[%s4405_s2] ss:$0 sm:$0xff]  ;;  %s4300_s2 = scalar_lea.hbm %s4409_s25, %s2894_s15 }
 0x634   : > { %3153 = vmatprep.mubr.msk.bf16.mxu1 %vm1260_vm4, %v2143_v30 }
 0x635   : > { %3154 = vmatmul.mubr.msk.bf16.vlgmr.msra.gmra.mrb[64].mxu1 %vm1260_vm4, %v2144_v37 }
 0x63a   : > { %v3135_v32 = vpop.f32.mrb[36].mxu0 }
 0x63b   : > { %v2057_v34 = vadd.f32 %v3135_v32, %v4157_v12  ;;  %v2048_v36 = vpop.f32.mrb[37].mxu0 }
 0x63c   : > { %v2049_v38 = vadd.f32 %v4157_v12, %v2048_v36  ;;  %v3136_v39 = vpop.f32.mrb[38].mxu0 }
 0x63d   : > { %v2117_v55 = vmul.f32 0.1, %v2057_v34  ;;  %v2060_v40 = vadd.f32 %v3136_v39, %v4157_v12  ;;  %v2051_v58 = vpop.f32.mrb[39].mxu0  ;;  %vm2101_vm10 = vcmp.gt.f32.partialorder %v2057_v34, 0.0 }
 0x63e   : > { %v2115_v42 = vmul.f32 0.1, %v2049_v38  ;;  %v2052_v44 = vadd.f32 %v4157_v12, %v2051_v58  ;;  %vm2099_vm11 = vcmp.gt.f32.partialorder %v2049_v38, 0.0 }
 0x63f   : > { %vm2102_vm12 = vcmp.gt.f32.partialorder %v2060_v40, 0.0  ;;  %v2118_v45 = vmul.f32 0.1, %v2060_v40  ;;  %v2133_v48 = vsel %vm2101_vm10, %v2057_v34, %v2117_v55 }
 0x640   : > { %vm2100_vm13 = vcmp.gt.f32.partialorder %v2052_v44, 0.0  ;;  %v2116_v46 = vmul.f32 0.1, %v2052_v44  ;;  %v2131_v50 = vsel %vm2099_vm11, %v2049_v38, %v2115_v42 }
 0x641   : > { %v2134_v49 = vsel %vm2102_vm12, %v2060_v40, %v2118_v45 }
 0x642   : > { %v2146_v52 = vpack.c.bf16 %v2134_v49, %v2133_v48  ;;  %v2132_v51 = vsel %vm2100_vm13, %v2052_v44, %v2116_v46  ;;  %v3139_v56 = vpop.f32.mrb[40].mxu0 }
 0x643   : > { %v2145_v53 = vpack.c.bf16 %v2132_v51, %v2131_v50  ;;  %v2073_v54 = vadd.f32 %v3139_v56, %v4157_v12  ;;  %v2064_v5 = vpop.f32.mrb[41].mxu0 }
 0x644   : > { %v2065_v14 = vadd.f32 %v4157_v12, %v2064_v5  ;;  %v3140_v1 = vpop.f32.mrb[42].mxu0 }
 0x645   : > { %v2121_v10 = vmul.f32 0.1, %v2073_v54  ;;  %v2076_v57 = vadd.f32 %v3140_v1, %v4157_v12  ;;  %v2067_v43 = vpop.f32.mrb[43].mxu0  ;;  %3157 = vmatprep.mubr.msk.bf16.mxu1 %vm1260_vm4, %v2145_v53  ;;  %vm2105_vm14 = vcmp.gt.f32.partialorder %v2073_v54, 0.0 }
 0x646   : > { %v2119_v47 = vmul.f32 0.1, %v2065_v14  ;;  %v2068_v59 = vadd.f32 %v4157_v12, %v2067_v43  ;;  %3158 = vmatmul.mubr.msk.bf16.gmra.mrb[68].mxu1 %vm1260_vm4, %v2146_v52  ;;  %vm2103_vm15 = vcmp.gt.f32.partialorder %v2065_v14, 0.0 }
 0x647   : > { %vm2106_vm0 = vcmp.gt.f32.partialorder %v2076_v57, 0.0  ;;  %v2122_v60 = vmul.f32 0.1, %v2076_v57  ;;  %v2137_v62 = vsel %vm2105_vm14, %v2073_v54, %v2121_v10 }
 0x648   : > { %vm2104_vm1 = vcmp.gt.f32.partialorder %v2068_v59, 0.0  ;;  %v2120_v61 = vmul.f32 0.1, %v2068_v59  ;;  %v2135_v7 = vsel %vm2103_vm15, %v2065_v14, %v2119_v47 }
 0x649   : > { %v2138_v63 = vsel %vm2106_vm0, %v2076_v57, %v2122_v60 }
 0x64a   : > { %v2148_v0 = vpack.c.bf16 %v2138_v63, %v2137_v62  ;;  %v2136_v20 = vsel %vm2104_vm1, %v2068_v59, %v2120_v61  ;;  %v3143_v2 = vpop.f32.mrb[44].mxu0 }
 0x64b   : > { %v2147_v3 = vpack.c.bf16 %v2136_v20, %v2135_v7  ;;  %v2089_v17 = vadd.f32 %v3143_v2, %v4157_v12  ;;  %v2080_v23 = vpop.f32.mrb[45].mxu0 }
 0x64c   : > { %v2081_v15 = vadd.f32 %v4157_v12, %v2080_v23  ;;  %v3144_v4 = vpop.f32.mrb[46].mxu0 }
 0x64d   : > { %v2125_v6 = vmul.f32 0.1, %v2089_v17  ;;  %v2092_v9 = vadd.f32 %v3144_v4, %v4157_v12  ;;  %v2083_v11 = vpop.f32.mrb[47].mxu0  ;;  %3161 = vmatprep.mubr.msk.bf16.mxu1 %vm1260_vm4, %v2147_v3  ;;  %vm2109_vm2 = vcmp.gt.f32.partialorder %v2089_v17, 0.0 }
 0x64e   : > { %v2123_v33 = vmul.f32 0.1, %v2081_v15  ;;  %v2084_v16 = vadd.f32 %v4157_v12, %v2083_v11  ;;  %3162 = vmatmul.mubr.msk.bf16.gmra.mrb[72].mxu1 %vm1260_vm4, %v2148_v0  ;;  %vm2107_vm3 = vcmp.gt.f32.partialorder %v2081_v15, 0.0  ;;  %v3295_v12 = vld [vmem:[%s4366_s16 + $0x64] ss:$8 sps:$4 sm:$0xff]  }
 0x64f   : > { %vm2110_vm5 = vcmp.gt.f32.partialorder %v2092_v9, 0.0  ;;  %v2126_v18 = vmul.f32 0.1, %v2092_v9  ;;  %v2141_v21 = vsel %vm2109_vm2, %v2089_v17, %v2125_v6  ;;  %2487 = vmatprep.subr.bf16.mxu0 %v3295_v12 }
 0x650   : > { %vm2108_vm6 = vcmp.gt.f32.partialorder %v2084_v16, 0.0  ;;  %v2124_v19 = vmul.f32 0.1, %v2084_v16  ;;  %v2139_v35 = vsel %vm2107_vm3, %v2081_v15, %v2123_v33  ;;  %2488 = vmatpush1.bf16.msra.mxu0 %v3293_v25 }
 0x651   : > { %v2142_v22 = vsel %vm2110_vm5, %v2092_v9, %v2126_v18  ;;  %2489 = vmatprep.subr.bf16.mxu0 %v3298_v26 }
 0x652   : > { %v2150_v13 = vpack.c.bf16 %v2142_v22, %v2141_v21  ;;  %v2140_v41 = vsel %vm2108_vm6, %v2084_v16, %v2124_v19 }
 0x653   : > { %v2149_v24 = vpack.c.bf16 %v2140_v41, %v2139_v35 }
 0x654   : > { %2490 = vmatpush1.bf16.msra.mxu0 %v3296_v8 }
 0x655   : > { %3165 = vmatprep.mubr.msk.bf16.mxu1 %vm1260_vm4, %v2149_v24 }
 0x656   : > { %3166 = vmatmul.mubr.msk.bf16.gmra.mrb[76].mxu1 %vm1260_vm4, %v2150_v13 }
 0x708   : > { %v3155_v31 = vpop.f32.mrb[64].mxu1 }
 0x709   : > { %v2257_v37 = vadd.f32 %v3155_v31, %v4199_v28  ;;  %v2248_v29 = vpop.f32.mrb[65].mxu1 }
 0x70a   : > { %v2249_v30 = vadd.f32 %v4199_v28, %v2248_v29  ;;  %v3156_v32 = vpop.f32.mrb[66].mxu1 }
 0x70b   : > { %v2329_v34 = vmul.f32 0.1, %v2257_v37  ;;  %v2260_v36 = vadd.f32 %v3156_v32, %v4199_v28  ;;  %v2251_v38 = vpop.f32.mrb[67].mxu1  ;;  %vm2313_vm4 = vcmp.gt.f32.partialorder %v2257_v37, 0.0 }
 0x70c   : > { %v2327_v39 = vmul.f32 0.1, %v2249_v30  ;;  %v2252_v55 = vadd.f32 %v4199_v28, %v2251_v38  ;;  %vm2311_vm7 = vcmp.gt.f32.partialorder %v2249_v30, 0.0 }
 0x70d   : > { %vm2314_vm8 = vcmp.gt.f32.partialorder %v2260_v36, 0.0  ;;  %v2330_v40 = vmul.f32 0.1, %v2260_v36  ;;  %v2345_v42 = vsel %vm2313_vm4, %v2257_v37, %v2329_v34 }
 0x70e   : > { %vm2312_vm9 = vcmp.gt.f32.partialorder %v2252_v55, 0.0  ;;  %v2328_v58 = vmul.f32 0.1, %v2252_v55  ;;  %v2343_v45 = vsel %vm2311_vm7, %v2249_v30, %v2327_v39 }
 0x70f   : > { %v2346_v44 = vsel %vm2314_vm8, %v2260_v36, %v2330_v40 }
 0x710   : > { %v2344_v46 = vsel %vm2312_vm9, %v2252_v55, %v2328_v58  ;;  %v2360_v48 = vpack.c.bf16 %v2346_v44, %v2345_v42  ;;  %v2383_v42 = vld [vmem:[%s4406_s18] sm:$0x3]  ;;  %s3365_s18 = sshll.u32 %s3434_s0, 4  ;;  %s3366_s18 = int_to_ptr.vmem [resolvable:$false] %s3365_s18 }
 0x711   : > { %v2359_v49 = vpack.c.bf16 %v2344_v46, %v2343_v45  ;;  %s3367_s26 = scalar_lea.vmem %s3366_s18, 8192  ;;  %p3368_p10 = scmp.lt.s32.totalorder %s4302_s22, %s3366_s18 }
 0x712   : > { %p3369_p0 = scmp.lt.s32.totalorder %s3367_s26, %s3361_s3 }
 0x713   : > { %2508 = vmatmul.mubr.bf16.vlgmr.msra.gmra.mrb[48].mxu0 %v2359_v49 }
 0x714   : > { %2517 = vmatprep.mubr.bf16.mxu0 %v3433_v27  ;;  %p3370_p2 = por %p3369_p0, %p3368_p10 }
 0x716   : > { %p3371_p4 = pnand %p3370_p2, %p3364_p8 }
 0x719   : > { %v3159_v50 = vpop.f32.mrb[68].mxu1 }
 0x71a   : > { %v2273_v52 = vadd.f32 %v3159_v50, %v4199_v28  ;;  %v2264_v51 = vpop.f32.mrb[69].mxu1 }
 0x71b   : > { %v2265_v56 = vadd.f32 %v4199_v28, %v2264_v51  ;;  %v3160_v53 = vpop.f32.mrb[70].mxu1  ;;  %2518 = vmatmul.mubr.bf16.gmra.mrb[52].mxu0 %v2360_v48 }
 0x71c   : > { %v2333_v54 = vmul.f32 0.1, %v2273_v52  ;;  %v2276_v5 = vadd.f32 %v3160_v53, %v4199_v28  ;;  %v2267_v14 = vpop.f32.mrb[71].mxu1  ;;  %2527 = vmatprep.mubr.bf16.mxu0 %v3433_v27  ;;  %vm2317_vm10 = vcmp.gt.f32.partialorder %v2273_v52, 0.0 }
 0x71d   : > { %v2331_v1 = vmul.f32 0.1, %v2265_v56  ;;  %v2268_v10 = vadd.f32 %v4199_v28, %v2267_v14  ;;  %vm2315_vm11 = vcmp.gt.f32.partialorder %v2265_v56, 0.0 }
 0x71e   : > { %vm2318_vm12 = vcmp.gt.f32.partialorder %v2276_v5, 0.0  ;;  %v2334_v57 = vmul.f32 0.1, %v2276_v5  ;;  %v2349_v47 = vsel %vm2317_vm10, %v2273_v52, %v2333_v54 }
 0x71f   : > { %vm2316_vm13 = vcmp.gt.f32.partialorder %v2268_v10, 0.0  ;;  %v2332_v43 = vmul.f32 0.1, %v2268_v10  ;;  %v2347_v61 = vsel %vm2315_vm11, %v2265_v56, %v2331_v1 }
 0x720   : > { %v2350_v59 = vsel %vm2318_vm12, %v2276_v5, %v2334_v57 }
 0x721   : > { %v3163_v60 = vpop.f32.mrb[72].mxu1  ;;  %v2348_v62 = vsel %vm2316_vm13, %v2268_v10, %v2332_v43  ;;  %v2362_v63 = vpack.c.bf16 %v2350_v59, %v2349_v47 }
 0x722   : > { %v2289_v7 = vadd.f32 %v3163_v60, %v4199_v28  ;;  %v2280_v0 = vpop.f32.mrb[73].mxu1  ;;  %v2361_v20 = vpack.c.bf16 %v2348_v62, %v2347_v61 }
 0x723   : > { %v2281_v2 = vadd.f32 %v4199_v28, %v2280_v0  ;;  %v3164_v3 = vpop.f32.mrb[74].mxu1 }
 0x724   : > { %v2337_v17 = vmul.f32 0.1, %v2289_v7  ;;  %v2292_v23 = vadd.f32 %v3164_v3, %v4199_v28  ;;  %v2283_v15 = vpop.f32.mrb[75].mxu1  ;;  %2528 = vmatmul.mubr.bf16.gmra.mrb[56].mxu0 %v2361_v20  ;;  %vm2321_vm14 = vcmp.gt.f32.partialorder %v2289_v7, 0.0 }
 0x725   : > { %v2335_v4 = vmul.f32 0.1, %v2281_v2  ;;  %v2284_v6 = vadd.f32 %v4199_v28, %v2283_v15  ;;  %2537 = vmatprep.mubr.bf16.mxu0 %v3433_v27  ;;  %vm2319_vm15 = vcmp.gt.f32.partialorder %v2281_v2, 0.0 }
 0x726   : > { %vm2322_vm0 = vcmp.gt.f32.partialorder %v2292_v23, 0.0  ;;  %v2338_v9 = vmul.f32 0.1, %v2292_v23  ;;  %v2353_v33 = vsel %vm2321_vm14, %v2289_v7, %v2337_v17 }
 0x727   : > { %vm2320_vm1 = vcmp.gt.f32.partialorder %v2284_v6, 0.0  ;;  %v2336_v11 = vmul.f32 0.1, %v2284_v6  ;;  %v2351_v19 = vsel %vm2319_vm15, %v2281_v2, %v2335_v4 }
 0x728   : > { %v2354_v16 = vsel %vm2322_vm0, %v2292_v23, %v2338_v9 }
 0x729   : > { %v3167_v18 = vpop.f32.mrb[76].mxu1  ;;  %v2352_v21 = vsel %vm2320_vm1, %v2284_v6, %v2336_v11  ;;  %v2364_v22 = vpack.c.bf16 %v2354_v16, %v2353_v33 }
 0x72a   : > { %v2305_v35 = vadd.f32 %v3167_v18, %v4199_v28  ;;  %v2296_v13 = vpop.f32.mrb[77].mxu1  ;;  %v2363_v41 = vpack.c.bf16 %v2352_v21, %v2351_v19 }
 0x72b   : > { %v2297_v24 = vadd.f32 %v4199_v28, %v2296_v13  ;;  %v3168_v12 = vpop.f32.mrb[78].mxu1 }
 0x72c   : > { %v2341_v25 = vmul.f32 0.1, %v2305_v35  ;;  %v2308_v26 = vadd.f32 %v3168_v12, %v4199_v28  ;;  %v2299_v8 = vpop.f32.mrb[79].mxu1  ;;  %2538 = vmatmul.mubr.bf16.gmra.mrb[60].mxu0 %v2362_v63  ;;  %vm2325_vm2 = vcmp.gt.f32.partialorder %v2305_v35, 0.0 }
 0x72d   : > { %v2339_v31 = vmul.f32 0.1, %v2297_v24  ;;  %v2300_v37 = vadd.f32 %v4199_v28, %v2299_v8  ;;  %2547 = vmatprep.mubr.bf16.mxu0 %v3433_v27  ;;  %vm2323_vm3 = vcmp.gt.f32.partialorder %v2297_v24, 0.0  ;;  %v2385_v28 = vlaneseq }
 0x72e   : > { %vm2326_vm5 = vcmp.gt.f32.partialorder %v2308_v26, 0.0  ;;  %v2342_v29 = vmul.f32 0.1, %v2308_v26  ;;  %v2357_v32 = vsel %vm2325_vm2, %v2305_v35, %v2341_v25 }
 0x72f   : > { %vm2324_vm6 = vcmp.gt.f32.partialorder %v2300_v37, 0.0  ;;  %v2340_v30 = vmul.f32 0.1, %v2300_v37  ;;  %v2355_v36 = vsel %vm2323_vm3, %v2297_v24, %v2339_v31  ;;  %v2386_v40 = vshrl.u32 %v2385_v28, 7 }
 0x730   : > { %v2358_v34 = vsel %vm2326_vm5, %v2308_v26, %v2342_v29 }
 0x731   : > { %v2356_v38 = vsel %vm2324_vm6, %v2300_v37, %v2340_v30  ;;  %v2366_v39 = vpack.c.bf16 %v2358_v34, %v2357_v32  ;;  %v2387_v58 = vsub.s32 0, %v2386_v40  ;;  %v2391_v44 = vsub.s32 1, %v2386_v40 }
 0x732   : > { %v2365_v55 = vpack.c.bf16 %v2356_v38, %v2355_v36 }
 0x733   : > { %v4227_v45 = vrot.slane %v2383_v42, %v2387_v58  ;;  %v4229_v46 = vrot.slane %v2383_v42, %v2391_v44 }
 0x734   : > { %2548 = vmatmul.mubr.bf16.gmra.mrb[64].mxu0 %v2363_v41 }
 0x735   : > { %2557 = vmatprep.mubr.bf16.mxu0 %v3433_v27 }
 0x73c   : > { %2558 = vmatmul.mubr.bf16.gmra.mrb[68].mxu0 %v2364_v22 }
 0x73d   : > { %2567 = vmatprep.mubr.bf16.mxu0 %v3433_v27 }
 0x744   : > { %2568 = vmatmul.mubr.bf16.gmra.mrb[72].mxu0 %v2365_v55 }
 0x745   : > { %2577 = vmatprep.mubr.bf16.mxu0 %v3433_v27 }
 0x74c   : > { %2578 = vmatmul.mubr.bf16.gmra.mrb[76].mxu0 %v2366_v39 }
 0x7e6   : > { %v2509_v48 = vpop.f32.mrb[48].mxu0 }
 0x7e7   : > { %v2510_v49 = vadd.f32 %v2509_v48, %v4227_v45  ;;  %v2511_v50 = vpop.f32.mrb[49].mxu0 }
 0x7e8   : > { %v2512_v52 = vadd.f32 %v2511_v50, %v4229_v46  ;;  %v2513_v27 = vpop.f32.mrb[50].mxu0 }
 0x7e9   : > { %2588 = vst [vmem:[%s4235_s29] sm:$0xff] %v2510_v49  ;;  %v2514_v51 = vadd.f32 %v2513_v27, %v4227_v45  ;;  %v2515_v56 = vpop.f32.mrb[51].mxu0 }
 0x7ea   : > { %2589 = vst [vmem:[%s4235_s29 + $0x8] sm:$0xff] %v2512_v52  ;;  %v2516_v53 = vadd.f32 %v2515_v56, %v4229_v46 }
 0x7eb   : > { %2590 = vst [vmem:[%s4235_s29 + $0x10] sm:$0xff] %v2514_v51 }
 0x7ec   : > { %2591 = vst [vmem:[%s4235_s29 + $0x18] sm:$0xff] %v2516_v53 }
 0x7ee   : > { %v2519_v54 = vpop.f32.mrb[52].mxu0 }
 0x7ef   : > { %v2520_v5 = vadd.f32 %v2519_v54, %v4227_v45  ;;  %v2521_v14 = vpop.f32.mrb[53].mxu0 }
 0x7f0   : > { %v2522_v1 = vadd.f32 %v2521_v14, %v4229_v46  ;;  %v2523_v10 = vpop.f32.mrb[54].mxu0 }
 0x7f1   : > { %2592 = vst [vmem:[%s4235_s29 + $0x20] sm:$0xff] %v2520_v5  ;;  %v2524_v57 = vadd.f32 %v2523_v10, %v4227_v45  ;;  %v2525_v43 = vpop.f32.mrb[55].mxu0 }
 0x7f2   : > { %2593 = vst [vmem:[%s4235_s29 + $0x28] sm:$0xff] %v2522_v1  ;;  %v2526_v47 = vadd.f32 %v2525_v43, %v4229_v46 }
 0x7f3   : > { %2594 = vst [vmem:[%s4235_s29 + $0x30] sm:$0xff] %v2524_v57 }
 0x7f4   : > { %2595 = vst [vmem:[%s4235_s29 + $0x38] sm:$0xff] %v2526_v47 }
 0x7f7   : > { %v2529_v59 = vpop.f32.mrb[56].mxu0 }
 0x7f8   : > { %v2530_v60 = vadd.f32 %v2529_v59, %v4227_v45  ;;  %v2531_v61 = vpop.f32.mrb[57].mxu0 }
 0x7f9   : > { %v2532_v62 = vadd.f32 %v2531_v61, %v4229_v46  ;;  %v2533_v63 = vpop.f32.mrb[58].mxu0 }
 0x7fa   : > { %2596 = vst [vmem:[%s4235_s29 + $0x40] sm:$0xff] %v2530_v60  ;;  %v2534_v7 = vadd.f32 %v2533_v63, %v4227_v45  ;;  %v2535_v0 = vpop.f32.mrb[59].mxu0 }
 0x7fb   : > { %2597 = vst [vmem:[%s4235_s29 + $0x48] sm:$0xff] %v2532_v62  ;;  %v2536_v20 = vadd.f32 %v2535_v0, %v4229_v46 }
 0x7fc   : > { %2598 = vst [vmem:[%s4235_s29 + $0x50] sm:$0xff] %v2534_v7 }
 0x7fd   : > { %2599 = vst [vmem:[%s4235_s29 + $0x58] sm:$0xff] %v2536_v20 }
 0x7ff   : > { %v2539_v2 = vpop.f32.mrb[60].mxu0 }
 0x800   : > { %v2540_v3 = vadd.f32 %v2539_v2, %v4227_v45  ;;  %v2541_v17 = vpop.f32.mrb[61].mxu0 }
 0x801   : > { %v2542_v23 = vadd.f32 %v2541_v17, %v4229_v46  ;;  %v2543_v15 = vpop.f32.mrb[62].mxu0 }
 0x802   : > { %2600 = vst [vmem:[%s4235_s29 + $0x60] sm:$0xff] %v2540_v3  ;;  %v2544_v4 = vadd.f32 %v2543_v15, %v4227_v45  ;;  %v2545_v6 = vpop.f32.mrb[63].mxu0 }
 0x803   : > { %2601 = vst [vmem:[%s4235_s29 + $0x68] sm:$0xff] %v2542_v23  ;;  %v2546_v9 = vadd.f32 %v2545_v6, %v4229_v46 }
 0x804   : > { %2602 = vst [vmem:[%s4235_s29 + $0x70] sm:$0xff] %v2544_v4 }
 0x805   : > { %2603 = vst [vmem:[%s4235_s29 + $0x78] sm:$0xff] %v2546_v9 }
 0x807   : > { %v2549_v11 = vpop.f32.mrb[64].mxu0 }
 0x808   : > { %v2550_v33 = vadd.f32 %v2549_v11, %v4227_v45  ;;  %v2551_v16 = vpop.f32.mrb[65].mxu0 }
 0x809   : > { %v2552_v18 = vadd.f32 %v2551_v16, %v4229_v46  ;;  %v2553_v19 = vpop.f32.mrb[66].mxu0 }
 0x80a   : > { %2604 = vst [vmem:[%s4235_s29 + $0x80] sm:$0xff] %v2550_v33  ;;  %v2554_v21 = vadd.f32 %v2553_v19, %v4227_v45  ;;  %v2555_v22 = vpop.f32.mrb[67].mxu0 }
 0x80b   : > { %2605 = vst [vmem:[%s4235_s29 + $0x88] sm:$0xff] %v2552_v18  ;;  %v2556_v35 = vadd.f32 %v2555_v22, %v4229_v46 }
 0x80c   : > { %2606 = vst [vmem:[%s4235_s29 + $0x90] sm:$0xff] %v2554_v21 }
 0x80d   : > { %2607 = vst [vmem:[%s4235_s29 + $0x98] sm:$0xff] %v2556_v35 }
 0x80f   : > { %v2559_v13 = vpop.f32.mrb[68].mxu0 }
 0x810   : > { %v2560_v41 = vadd.f32 %v2559_v13, %v4227_v45  ;;  %v2561_v24 = vpop.f32.mrb[69].mxu0 }
 0x811   : > { %v2562_v12 = vadd.f32 %v2561_v24, %v4229_v46  ;;  %v2563_v25 = vpop.f32.mrb[70].mxu0 }
 0x812   : > { %2608 = vst [vmem:[%s4235_s29 + $0xa0] sm:$0xff] %v2560_v41  ;;  %v2564_v26 = vadd.f32 %v2563_v25, %v4227_v45  ;;  %v2565_v8 = vpop.f32.mrb[71].mxu0 }
 0x813   : > { %2609 = vst [vmem:[%s4235_s29 + $0xa8] sm:$0xff] %v2562_v12  ;;  %v2566_v31 = vadd.f32 %v2565_v8, %v4229_v46 }
 0x814   : > { %2610 = vst [vmem:[%s4235_s29 + $0xb0] sm:$0xff] %v2564_v26 }
 0x815   : > { %2611 = vst [vmem:[%s4235_s29 + $0xb8] sm:$0xff] %v2566_v31 }
 0x817   : > { %v2569_v37 = vpop.f32.mrb[72].mxu0 }
 0x818   : > { %v2570_v29 = vadd.f32 %v2569_v37, %v4227_v45  ;;  %v2571_v30 = vpop.f32.mrb[73].mxu0 }
 0x819   : > { %v2572_v32 = vadd.f32 %v2571_v30, %v4229_v46  ;;  %v2573_v34 = vpop.f32.mrb[74].mxu0 }
 0x81a   : > { %2612 = vst [vmem:[%s4235_s29 + $0xc0] sm:$0xff] %v2570_v29  ;;  %v2574_v36 = vadd.f32 %v2573_v34, %v4227_v45  ;;  %v2575_v38 = vpop.f32.mrb[75].mxu0 }
 0x81b   : > { %2613 = vst [vmem:[%s4235_s29 + $0xc8] sm:$0xff] %v2572_v32  ;;  %v2576_v39 = vadd.f32 %v2575_v38, %v4229_v46 }
 0x81c   : > { %2614 = vst [vmem:[%s4235_s29 + $0xd0] sm:$0xff] %v2574_v36 }
 0x81d   : > { %2615 = vst [vmem:[%s4235_s29 + $0xd8] sm:$0xff] %v2576_v39 }
 0x81f   : > { %v2579_v55 = vpop.f32.mrb[76].mxu0 }
 0x820   : > { %v2580_v28 = vadd.f32 %v2579_v55, %v4227_v45  ;;  %v2581_v40 = vpop.f32.mrb[77].mxu0 }
 0x821   : > { %v2582_v58 = vadd.f32 %v2581_v40, %v4229_v46  ;;  %v2583_v42 = vpop.f32.mrb[78].mxu0 }
 0x822   : > { %2616 = vst [vmem:[%s4235_s29 + $0xe0] sm:$0xff] %v2580_v28  ;;  %v2584_v44 = vadd.f32 %v2583_v42, %v4227_v45  ;;  %v2585_v48 = vpop.f32.mrb[79].mxu0 }
 0x823   : > { %2617 = vst [vmem:[%s4235_s29 + $0xe8] sm:$0xff] %v2582_v58  ;;  %v2586_v49 = vadd.f32 %v2585_v48, %v4229_v46 }
 0x824   : > { %2618 = vst [vmem:[%s4235_s29 + $0xf0] sm:$0xff] %v2584_v44 }
 0x825   : > { %2619 = vst [vmem:[%s4235_s29 + $0xf8] sm:$0xff] %v2586_v49 }
 0x826   : > { %3374 = shalt.err (!%p3371_p4)
}
 0x827   : > { %s3375_s29 = scalar_lea.hbm %s4300_s2, 4096  ;;  %s3379_s24 = scalar_lea.hbm %s4409_s25, 8192 }
 0x828   : > { %p3376_p5 = scmp.ne.s32.totalorder %s4300_s2, %s3375_s29  ;;  %p3380_p1 = scmp.lt.u32.totalorder %s4300_s2, %s4409_s25 }
 0x829   : > { %p3381_p3 = scmp.lt.u32.totalorder %s3379_s24, %s3375_s29  ;;  %p3383_p11 = scmp.lt.u32.totalorder %s3375_s29, %s4300_s2 }
 0x82a   : > { %p3377_p7 = pnand %p3376_p5, %p4410_p12 }
 0x82b   : > { %p3382_p6 = por %p3381_p3, %p3380_p1 }
 0x82c   : > { %p3378_p9 = pneg %p3377_p7 }
 0x82d   : > { %p3384_p13 = por %p3383_p11, %p3382_p6 }
 0x82f   : > { %p3385_p8 = pnand %p3384_p13, %p3378_p9 }
 0x831   : > { %3388 = shalt.err (!%p3385_p8)
}
 0x832   : > { %s3435_s3 = smov 256   ;;  %s3436_s26 = smov 16  }
 0x833   : > { %3187 = dma.vmem_to_hbm [thread:$0]  (%p4410_p12), %s4302_s22, 4096, %s4300_s2, %s2637_s1, %s3435_s3, %s3435_s3, %s3436_s26  }
 0x834 PF: > { %s4411_s15 = sld [smem:[#allocation8_spill]]  ;;  %p4412_p10 = scmp.ne.s32.totalorder %s4397_s28, 0 }
 0x835   : > { %p4413_p0 = scmp.ge.s32.totalorder %s3427_s21, 2 }
 0x837   : > { %p3194_p2 = pnand %p4413_p0, %p4412_p10 }
 0x83a   : > { %s2675_s20 = sand.u32 1, %s4411_s15  }
 0x83b   : > { %s2676_s29 = scalar_lea.sflag [#allocation4], %s2675_s20 }
 0x83c   : > { %3410 = dma.done.wait (!%p3194_p2), %s2676_s29, 4096  }
 0x83d   : > { %3412 = vsyncadd (!%p3194_p2), %s2676_s29, 4294963200  ;;  %s4414_s21 = sld [smem:[#allocation10_spill]]  ;;  %s4415_s24 = sld [smem:[#allocation9_spill]] }
 0x83e   : > { %s4416_s20 = sld [smem:[#allocation11_spill]]  ;;  %s4417_s0 = smov %s3419_s30 }
 0x843   : > { %p33_p4 = scmp.ge.s32.totalorder %s4414_s21, 4   ;;  %s4418_s30 = smov %s4415_s24 }
 0x845   :  { %35 = sbr.rel (!%p33_p4) target bundleno = 13 (0xd), region = 152 }
 0x84c   :  { %2689 = vsyncpa [#allocation3], 1 }
 0x84d   :  { %2691 = vsyncpa [#allocation3 + $0x1], 1 }
 0x84e   :  { %2692 = vsyncpa [#allocation4], 1 }
 0x84f   :  { %2694 = vsyncpa [#allocation4 + $0x1], 1 }

</bundles_post_ra>
